<compile_context>
chip_gen: v6e
topology: v6e:2x2x1
jax: 0.10.0
libtpu: 0.0.40
codegen_flags: <defaults>
</compile_context>

<pallas_src>
import functools
import math

import jax
import jax.numpy as jnp
from jax.experimental import pallas as pl
from jax.experimental.pallas import tpu as pltpu


# ----------------------------- fused Pallas kernel -----------------------------

def _vit_encoder_kernel(
    xaug_ref, waug_ref, addb_ref, hsum_ref, hexp_ref, pool_ref,
    wqkv_ref, bqkv_ref, wo_ref, bo_ref, w1_ref, b1_ref, w2_ref, b2_ref,
    ln1g_ref, ln1b_ref, ln2g_ref, ln2b_ref,
    fcw_ref, fcb_ref,
    out_ref,
    *, B, S_pad, E, Hn, num_layers, eps):
  """Whole ViT encoder in one kernel invocation; everything resident in VMEM."""
  f32 = jnp.float32
  hd = E // Hn
  scale = 1.0 / math.sqrt(hd)

  def mm(a, w, b=None):
    # bf16 MXU operands, f32 accumulation.  Weights are pre-cast in the wrapper
    # (astype is a no-op for them); only the f32 activation operand is cast.
    y = jnp.dot(a.astype(jnp.bfloat16), w.astype(jnp.bfloat16),
                preferred_element_type=f32)
    return y if b is None else y + b

  def layer_norm(v, g, b):
    mu = jnp.mean(v, axis=-1, keepdims=True)
    c = v - mu
    var = jnp.mean(c * c, axis=-1, keepdims=True)
    return c * jax.lax.rsqrt(var + eps) * g + b

  head_sum = hsum_ref[...]      # (B*E, B*Hn) bf16 block-diagonal: per-head sum
  head_expand = hexp_ref[...]   # (B*Hn, B*E) bf16 block-diagonal: per-head bcast

  # ---- patch embedding (+ cls row via indicator column) + positional bias ----
  # Padded token rows are zero in x_aug and add_bias, so they stay finite and
  # never touch real rows (attention only mixes tokens at the SAME position s).
  h = mm(xaug_ref[...], waug_ref[...]) + addb_ref[...]          # (B*S_pad, E) f32

  # ---- transformer encoder layers (post-norm, ReLU FFN, eval-mode dropout) ----
  for l in range(num_layers):
    # Fused QKV: one slab matmul.
    qkv = mm(h, wqkv_ref[l], bqkv_ref[l])                       # (B*S_pad, 3E)
    q = qkv[:, :E]
    k = qkv[:, E:2 * E]
    v = qkv[:, 2 * E:]

    # Lane-concatenate keys/values of every image at the same token position s,
    # then tile across the query-image axis -> (B*S_pad, B*E).
    k_cat = jnp.concatenate(
        [k[j * S_pad:(j + 1) * S_pad, :] for j in range(B)], axis=-1)
    v_cat = jnp.concatenate(
        [v[j * S_pad:(j + 1) * S_pad, :] for j in range(B)], axis=-1)
    k_all = jnp.concatenate([k_cat] * B, axis=0)
    v_all = jnp.concatenate([v_cat] * B, axis=0)
    q_all = jnp.concatenate([q] * B, axis=-1)

    # scores[(i, s), j*Hn + head] for ALL (i, j, s, head) in one MXU matmul.
    scores = mm(q_all * k_all, head_sum) * scale                 # (B*S_pad, B*Hn)

    # softmax over the key-image axis j (column groups of Hn).
    m = scores[:, :Hn]
    for j in range(1, B):
      m = jnp.maximum(m, scores[:, j * Hn:(j + 1) * Hn])
    ex = jnp.exp(scores - jnp.concatenate([m] * B, axis=-1))
    den = ex[:, :Hn]
    for j in range(1, B):
      den = den + ex[:, j * Hn:(j + 1) * Hn]
    inv = pl.reciprocal(den, approx=True)                        # EUP slot (~free)
    p = ex * jnp.concatenate([inv] * B, axis=-1)                 # (B*S_pad, B*Hn)

    # Broadcast per-head probs over their lanes, weight the values; the sum over
    # the key-image axis is folded into the row-tiled out-projection weight.
    ctx = mm(p, head_expand) * v_all                             # (B*S_pad, B*E)
    attn = mm(ctx, wo_ref[l], bo_ref[l])                         # (B*S_pad, E)

    h1 = layer_norm(h + attn, ln1g_ref[l], ln1b_ref[l])          # fused add+LN
    ff = jnp.maximum(mm(h1, w1_ref[l], b1_ref[l]), 0.0)          # lane-dense 4E
    h = layer_norm(h1 + mm(ff, w2_ref[l], b2_ref[l]),
                   ln2g_ref[l], ln2b_ref[l])

  # ---- masked mean over real tokens + final fc, single full store ----
  # Pooling kept in f32 (one tiny matmul) to preserve residual-stream precision.
  pooled = jnp.dot(pool_ref[...], h, preferred_element_type=f32)  # (B, E)
  out_ref[...] = mm(pooled, fcw_ref[...], fcb_ref[...]).astype(out_ref.dtype)


# ----------------------------- wrapper -----------------------------

def vit_encoder_forward(x, params, cfg):
  """Runs the full ViTEncoder forward as one fused Pallas kernel."""
  B, C, H, W = x.shape
  P = cfg["patch_size"]
  E = cfg["emb_size"]
  Hn = cfg["num_heads"]
  nl = cfg["num_layers"]
  F = cfg["feature_dim"]
  nph, npw = H // P, W // P
  N = nph * npw
  S = N + 1
  S_pad = ((S + 7) // 8) * 8                      # sublane-aligned token count
  CPP = C * P * P
  K_pad = ((CPP + 1 + 127) // 128) * 128          # lane-aligned contraction dim
  hd = E // Hn
  f32, bf16 = jnp.float32, jnp.bfloat16

  # ---- one-time XLA glue: patch extraction + parameter folding/padding ----
  patches = (
      x.reshape(B, C, nph, P, npw, P)
      .transpose(0, 2, 4, 1, 3, 5)                # (B, nph, npw, C, P, P)
      .reshape(B, N, CPP)
  )
  # Token-padded, K-padded input slab; cls token comes from an indicator column.
  feat = jnp.zeros((B, S_pad, K_pad), f32)
  feat = feat.at[:, 1:N + 1, :CPP].set(patches)
  feat = feat.at[:, 0, CPP].set(1.0)
  x_aug = feat.reshape(B * S_pad, K_pad).astype(bf16)

  patch_b = params["patch_b"].reshape(1, E)
  cls_row = params["cls_token"].reshape(1, E)
  pos = params["pos_emb"].reshape(S, E)

  w_aug = jnp.zeros((K_pad, E), f32)
  w_aug = w_aug.at[:CPP, :].set(params["patch_w"])
  w_aug = w_aug.at[CPP, :].set((cls_row - patch_b).reshape(E))
  w_aug = w_aug.astype(bf16)

  add_bias = jnp.zeros((B, S_pad, E), f32)        # zero on padded token rows
  add_bias = add_bias.at[:, :S, :].set(pos + patch_b)
  add_bias = add_bias.reshape(B * S_pad, E)

  # Block-diagonal head matrices (0/1 -> bf16 is lossless): batched over the
  # key-image axis so scores / expand are single MXU matmuls on the full slab.
  head_id = jnp.arange(E, dtype=jnp.int32) // hd
  hs_small = (head_id[:, None] == jnp.arange(Hn, dtype=jnp.int32)[None, :]
              ).astype(f32)                                             # (E, Hn)
  head_sum = jnp.kron(jnp.eye(B, dtype=f32), hs_small).astype(bf16)     # (B*E, B*Hn)
  head_expand = jnp.kron(jnp.eye(B, dtype=f32), hs_small.T).astype(bf16)

  # Masked averaging matrix: 1/S on real token rows of image i, 0 on padding.
  col = jnp.arange(B * S_pad)
  pool_mask = (((col // S_pad)[None, :] == jnp.arange(B)[:, None])
               & ((col % S_pad)[None, :] < S)).astype(f32) / S          # (B, B*S_pad)

  # Fused / tiled / pre-cast (bf16) weights; biases & LN params stay f32.
  wqkv = jnp.concatenate([params["wq"], params["wk"], params["wv"]],
                         axis=-1).astype(bf16)                          # (nl, E, 3E)
  bqkv = jnp.concatenate([params["bq"], params["bk"], params["bv"]], axis=-1)
  wo_tiled = jnp.concatenate([params["wo"]] * B, axis=1).astype(bf16)   # (nl, B*E, E)
  w1 = params["w1"].astype(bf16)
  w2 = params["w2"].astype(bf16)
  fc_w = params["fc_w"].astype(bf16)

  kernel = functools.partial(
      _vit_encoder_kernel, B=B, S_pad=S_pad, E=E, Hn=Hn, num_layers=nl, eps=1e-5)

  args = (
      x_aug, w_aug, add_bias, head_sum, head_expand, pool_mask,
      wqkv, bqkv, wo_tiled, params["bo"],
      w1, params["b1"], w2, params["b2"],
      params["ln1_g"], params["ln1_b"], params["ln2_g"], params["ln2_b"],
      fc_w, params["fc_b"].reshape(1, F),
  )
  vmem = pltpu.MemorySpace.VMEM
  # TODO(synk): for realistic ViT sizes (E=768, 12 layers) keep the stacked
  # per-layer weights in HBM with a grid axis over layers (index_map l->l,
  # "arbitrary" semantics, bf16, double-buffered) and set
  # pltpu.CompilerParams(vmem_limit_bytes=...) so 2x per-layer weights +
  # activations fit v7x's 64 MiB VMEM; add a "parallel" grid axis (padded token
  # super-blocks with partial-sum pooling) to engage the second TensorCore.
  # At B=2 / S=17 / E=32 a single fused grid-less invocation is fastest.
  return pl.pallas_call(
      kernel,
      out_shape=jax.ShapeDtypeStruct((B, F), jnp.float32),
      in_specs=[pl.BlockSpec(memory_space=vmem)] * len(args),
      out_specs=pl.BlockSpec(memory_space=vmem),
  )(*args)


# ----------------------------- pure-JAX reference -----------------------------

def vit_encoder_reference(x, params, cfg):
  """Non-Pallas reference with identical semantics (for self-checking)."""
  B, C, H, W = x.shape
  P, E, Hn = cfg["patch_size"], cfg["emb_size"], cfg["num_heads"]
  nl = cfg["num_layers"]
  nph, npw = H // P, W // P
  N = nph * npw
  S = N + 1
  hd = E // Hn

  patches = (x.reshape(B, C, nph, P, npw, P).transpose(0, 2, 4, 1, 3, 5)
             .reshape(B * N, C * P * P))
  emb = (patches @ params["patch_w"] + params["patch_b"]).reshape(B, N, E)
  cls = jnp.broadcast_to(params["cls_token"], (B, 1, E))
  h = jnp.concatenate([cls, emb], axis=1) + params["pos_emb"]      # (B, S, E)

  def ln(v, g, b):
    mu = v.mean(-1, keepdims=True)
    var = ((v - mu) ** 2).mean(-1, keepdims=True)
    return (v - mu) / jnp.sqrt(var + 1e-5) * g + b

  for l in range(nl):
    q = (h @ params["wq"][l] + params["bq"][l, 0]).reshape(B, S, Hn, hd)
    k = (h @ params["wk"][l] + params["bk"][l, 0]).reshape(B, S, Hn, hd)
    v = (h @ params["wv"][l] + params["bv"][l, 0]).reshape(B, S, Hn, hd)
    # batch_first=False: attention over dim 0, batched over (patch, head)
    scores = jnp.einsum("ishd,jshd->shij", q, k) / math.sqrt(hd)
    p = jax.nn.softmax(scores, axis=-1)
    o = jnp.einsum("shij,jshd->ishd", p, v).reshape(B, S, E)
    h1 = ln(h + o @ params["wo"][l] + params["bo"][l, 0],
            params["ln1_g"][l, 0], params["ln1_b"][l, 0])
    ff = jax.nn.relu(h1 @ params["w1"][l] + params["b1"][l, 0])
    ff = ff @ params["w2"][l] + params["b2"][l, 0]
    h = ln(h1 + ff, params["ln2_g"][l, 0], params["ln2_b"][l, 0])

  return h.mean(axis=1) @ params["fc_w"] + params["fc_b"]


# ----------------------------- parameter init -----------------------------

def init_params(key, cfg):
  C, P, E = cfg["channel"], cfg["patch_size"], cfg["emb_size"]
  nl, F = cfg["num_layers"], cfg["feature_dim"]
  N = (cfg["image_size"] // P) ** 2
  keys = iter(jax.random.split(key, 16))

  def w(shape, scale=0.02):
    return (scale * jax.random.normal(next(keys), shape)).astype(jnp.float32)

  zeros = lambda s: jnp.zeros(s, jnp.float32)
  ones = lambda s: jnp.ones(s, jnp.float32)
  return {
      # Conv2d(C, E, P, P) weight flattened to (C*P*P, E) for patches @ W
      "patch_w": w((C * P * P, E)),
      "patch_b": w((E,)),
      "cls_token": w((1, 1, E), 1.0),           # torch.randn
      "pos_emb": w((1, N + 1, E), 1.0),         # torch.randn
      "fc_w": w((E, F)),
      "fc_b": zeros((F,)),
      # per-layer weights stacked along a leading layer axis
      "wq": w((nl, E, E)), "wk": w((nl, E, E)), "wv": w((nl, E, E)),
      "bq": zeros((nl, 1, E)), "bk": zeros((nl, 1, E)), "bv": zeros((nl, 1, E)),
      "wo": w((nl, E, E)), "bo": zeros((nl, 1, E)),
      "w1": w((nl, E, 4 * E)), "b1": zeros((nl, 1, 4 * E)),
      "w2": w((nl, 4 * E, E)), "b2": zeros((nl, 1, E)),
      "ln1_g": ones((nl, 1, E)), "ln1_b": zeros((nl, 1, E)),
      "ln2_g": ones((nl, 1, E)), "ln2_b": zeros((nl, 1, E)),
  }


# ----------------------------- main -----------------------------

if __name__ == "__main__":
  cfg = dict(image_size=16, patch_size=4, emb_size=32, num_heads=4,
             num_layers=2, feature_dim=16, dropout=0.0, channel=4)

  key = jax.random.PRNGKey(0)
  pkey, xkey = jax.random.split(key)
  params = init_params(pkey, cfg)

  # x: (batch=2, channel=4, H=16, W=16), NCHW like PyTorch
  x = jax.random.normal(
      xkey, (2, cfg["channel"], cfg["image_size"], cfg["image_size"]), jnp.float32)

  fwd = jax.jit(functools.partial(vit_encoder_forward, cfg=cfg))
  out = jax.block_until_ready(fwd(x, params))

  assert out.shape == (2, cfg["feature_dim"]), out.shape
  assert bool(jnp.all(jnp.isfinite(out)))

  # Self-check against the pure-JAX reference (loose tol: bf16 MXU operands).
  ref = jax.block_until_ready(vit_encoder_reference(x, params, cfg))
  err = float(jnp.max(jnp.abs(out - ref)))
  assert err < 5e-3, f"max abs error vs reference: {err}"

  print("KERNEL_OK")
</pallas_src>

<mosaic_0001>
module attributes {stable_mosaic.version = 11 : i64} {
  func.func @_vit_encoder_kernel(%arg0: memref<48x128xbf16, #tpu.memory_space<vmem>>, %arg1: memref<128x32xbf16, #tpu.memory_space<vmem>>, %arg2: memref<48x32xf32, #tpu.memory_space<vmem>>, %arg3: memref<64x8xbf16, #tpu.memory_space<vmem>>, %arg4: memref<8x64xbf16, #tpu.memory_space<vmem>>, %arg5: memref<2x48xf32, #tpu.memory_space<vmem>>, %arg6: memref<2x32x96xbf16, #tpu.memory_space<vmem>>, %arg7: memref<2x1x96xf32, #tpu.memory_space<vmem>>, %arg8: memref<2x64x32xbf16, #tpu.memory_space<vmem>>, %arg9: memref<2x1x32xf32, #tpu.memory_space<vmem>>, %arg10: memref<2x32x128xbf16, #tpu.memory_space<vmem>>, %arg11: memref<2x1x128xf32, #tpu.memory_space<vmem>>, %arg12: memref<2x128x32xbf16, #tpu.memory_space<vmem>>, %arg13: memref<2x1x32xf32, #tpu.memory_space<vmem>>, %arg14: memref<2x1x32xf32, #tpu.memory_space<vmem>>, %arg15: memref<2x1x32xf32, #tpu.memory_space<vmem>>, %arg16: memref<2x1x32xf32, #tpu.memory_space<vmem>>, %arg17: memref<2x1x32xf32, #tpu.memory_space<vmem>>, %arg18: memref<32x16xbf16, #tpu.memory_space<vmem>>, %arg19: memref<1x16xf32, #tpu.memory_space<vmem>>, %arg20: memref<2x16xf32, #tpu.memory_space<vmem>>) attributes {dimension_semantics = [], scalar_prefetch = 0 : i64, scratch_operands = 0 : i64, tpu.core_type = #tpu.core_type<tc>} {
    %c0 = arith.constant 0 : index
    %c0_0 = arith.constant 0 : index
    %0 = vector.load %arg3[%c0, %c0_0] : memref<64x8xbf16, #tpu.memory_space<vmem>>, vector<64x8xbf16>
    %c0_1 = arith.constant 0 : index
    %c0_2 = arith.constant 0 : index
    %1 = vector.load %arg4[%c0_1, %c0_2] : memref<8x64xbf16, #tpu.memory_space<vmem>>, vector<8x64xbf16>
    %c0_3 = arith.constant 0 : index
    %c0_4 = arith.constant 0 : index
    %2 = vector.load %arg0[%c0_3, %c0_4] : memref<48x128xbf16, #tpu.memory_space<vmem>>, vector<48x128xbf16>
    %c0_5 = arith.constant 0 : index
    %c0_6 = arith.constant 0 : index
    %3 = vector.load %arg1[%c0_5, %c0_6] : memref<128x32xbf16, #tpu.memory_space<vmem>>, vector<128x32xbf16>
    %cst = arith.constant dense<0.000000e+00> : vector<48x32xf32>
    %4 = tpu.matmul %2, %3, %cst {dimension_numbers = #tpu.dot_dimension_numbers<[1], [0], [0], [1], [0, 0, 1, 1], [], []>} : vector<48x128xbf16>, vector<128x32xbf16>, vector<48x32xf32> -> vector<48x32xf32>
    %c0_7 = arith.constant 0 : index
    %c0_8 = arith.constant 0 : index
    %5 = vector.load %arg2[%c0_7, %c0_8] : memref<48x32xf32, #tpu.memory_space<vmem>>, vector<48x32xf32>
    %6 = arith.addf %4, %5 : vector<48x32xf32>
    %c0_9 = arith.constant 0 : index
    %c0_10 = arith.constant 0 : index
    %c0_11 = arith.constant 0 : index
    %7 = vector.load %arg6[%c0_9, %c0_10, %c0_11] : memref<2x32x96xbf16, #tpu.memory_space<vmem>>, vector<1x32x96xbf16>
    %8 = vector.shape_cast %7 : vector<1x32x96xbf16> to vector<32x96xbf16>
    %c0_12 = arith.constant 0 : index
    %c0_13 = arith.constant 0 : index
    %c0_14 = arith.constant 0 : index
    %9 = vector.load %arg7[%c0_12, %c0_13, %c0_14] : memref<2x1x96xf32, #tpu.memory_space<vmem>>, vector<1x1x96xf32>
    %10 = vector.shape_cast %9 : vector<1x1x96xf32> to vector<1x96xf32>
    %11 = arith.truncf %6 : vector<48x32xf32> to vector<48x32xbf16>
    %cst_15 = arith.constant dense<0.000000e+00> : vector<48x96xf32>
    %12 = tpu.matmul %11, %8, %cst_15 {dimension_numbers = #tpu.dot_dimension_numbers<[1], [0], [0], [1], [0, 0, 1, 1], [], []>} : vector<48x32xbf16>, vector<32x96xbf16>, vector<48x96xf32> -> vector<48x96xf32>
    %13 = vector.broadcast %10 : vector<1x96xf32> to vector<48x96xf32>
    %14 = arith.addf %12, %13 : vector<48x96xf32>
    %15 = vector.extract_strided_slice %14 {offsets = [0, 0], sizes = [48, 32], strides = [1, 1]} : vector<48x96xf32> to vector<48x32xf32>
    %16 = vector.extract_strided_slice %14 {offsets = [0, 32], sizes = [48, 32], strides = [1, 1]} : vector<48x96xf32> to vector<48x32xf32>
    %17 = vector.extract_strided_slice %14 {offsets = [0, 64], sizes = [48, 32], strides = [1, 1]} : vector<48x96xf32> to vector<48x32xf32>
    %18 = vector.extract_strided_slice %16 {offsets = [0, 0], sizes = [24, 32], strides = [1, 1]} : vector<48x32xf32> to vector<24x32xf32>
    %19 = vector.extract_strided_slice %16 {offsets = [24, 0], sizes = [24, 32], strides = [1, 1]} : vector<48x32xf32> to vector<24x32xf32>
    %20 = tpu.concatenate %18, %19 in 1 : vector<24x32xf32>, vector<24x32xf32> -> vector<24x64xf32>
    %21 = vector.extract_strided_slice %17 {offsets = [0, 0], sizes = [24, 32], strides = [1, 1]} : vector<48x32xf32> to vector<24x32xf32>
    %22 = vector.extract_strided_slice %17 {offsets = [24, 0], sizes = [24, 32], strides = [1, 1]} : vector<48x32xf32> to vector<24x32xf32>
    %23 = tpu.concatenate %21, %22 in 1 : vector<24x32xf32>, vector<24x32xf32> -> vector<24x64xf32>
    %24 = tpu.concatenate %20, %20 in 0 : vector<24x64xf32>, vector<24x64xf32> -> vector<48x64xf32>
    %25 = tpu.concatenate %23, %23 in 0 : vector<24x64xf32>, vector<24x64xf32> -> vector<48x64xf32>
    %26 = tpu.concatenate %15, %15 in 1 : vector<48x32xf32>, vector<48x32xf32> -> vector<48x64xf32>
    %27 = arith.mulf %26, %24 : vector<48x64xf32>
    %28 = arith.truncf %27 : vector<48x64xf32> to vector<48x64xbf16>
    %cst_16 = arith.constant dense<0.000000e+00> : vector<48x8xf32>
    %29 = tpu.matmul %28, %0, %cst_16 {dimension_numbers = #tpu.dot_dimension_numbers<[1], [0], [0], [1], [0, 0, 1, 1], [], []>} : vector<48x64xbf16>, vector<64x8xbf16>, vector<48x8xf32> -> vector<48x8xf32>
    %cst_17 = arith.constant 0.353553385 : f32
    %30 = vector.broadcast %cst_17 : f32 to vector<48x8xf32>
    %31 = arith.mulf %29, %30 : vector<48x8xf32>
    %32 = vector.extract_strided_slice %31 {offsets = [0, 0], sizes = [48, 4], strides = [1, 1]} : vector<48x8xf32> to vector<48x4xf32>
    %33 = vector.extract_strided_slice %31 {offsets = [0, 4], sizes = [48, 4], strides = [1, 1]} : vector<48x8xf32> to vector<48x4xf32>
    %34 = arith.maximumf %32, %33 : vector<48x4xf32>
    %35 = tpu.concatenate %34, %34 in 1 : vector<48x4xf32>, vector<48x4xf32> -> vector<48x8xf32>
    %36 = arith.subf %31, %35 : vector<48x8xf32>
    %37 = math.exp %36 : vector<48x8xf32>
    %38 = vector.extract_strided_slice %37 {offsets = [0, 0], sizes = [48, 4], strides = [1, 1]} : vector<48x8xf32> to vector<48x4xf32>
    %39 = vector.extract_strided_slice %37 {offsets = [0, 4], sizes = [48, 4], strides = [1, 1]} : vector<48x8xf32> to vector<48x4xf32>
    %40 = arith.addf %38, %39 : vector<48x4xf32>
    %41 = tpu.reciprocal %40 {approx = true} : vector<48x4xf32> -> vector<48x4xf32>
    %42 = tpu.concatenate %41, %41 in 1 : vector<48x4xf32>, vector<48x4xf32> -> vector<48x8xf32>
    %43 = arith.mulf %37, %42 : vector<48x8xf32>
    %44 = arith.truncf %43 : vector<48x8xf32> to vector<48x8xbf16>
    %cst_18 = arith.constant dense<0.000000e+00> : vector<48x64xf32>
    %45 = tpu.matmul %44, %1, %cst_18 {dimension_numbers = #tpu.dot_dimension_numbers<[1], [0], [0], [1], [0, 0, 1, 1], [], []>} : vector<48x8xbf16>, vector<8x64xbf16>, vector<48x64xf32> -> vector<48x64xf32>
    %46 = arith.mulf %45, %25 : vector<48x64xf32>
    %c0_19 = arith.constant 0 : index
    %c0_20 = arith.constant 0 : index
    %c0_21 = arith.constant 0 : index
    %47 = vector.load %arg8[%c0_19, %c0_20, %c0_21] : memref<2x64x32xbf16, #tpu.memory_space<vmem>>, vector<1x64x32xbf16>
    %48 = vector.shape_cast %47 : vector<1x64x32xbf16> to vector<64x32xbf16>
    %c0_22 = arith.constant 0 : index
    %c0_23 = arith.constant 0 : index
    %c0_24 = arith.constant 0 : index
    %49 = vector.load %arg9[%c0_22, %c0_23, %c0_24] : memref<2x1x32xf32, #tpu.memory_space<vmem>>, vector<1x1x32xf32>
    %50 = vector.shape_cast %49 : vector<1x1x32xf32> to vector<1x32xf32>
    %51 = arith.truncf %46 : vector<48x64xf32> to vector<48x64xbf16>
    %cst_25 = arith.constant dense<0.000000e+00> : vector<48x32xf32>
    %52 = tpu.matmul %51, %48, %cst_25 {dimension_numbers = #tpu.dot_dimension_numbers<[1], [0], [0], [1], [0, 0, 1, 1], [], []>} : vector<48x64xbf16>, vector<64x32xbf16>, vector<48x32xf32> -> vector<48x32xf32>
    %53 = vector.broadcast %50 : vector<1x32xf32> to vector<48x32xf32>
    %54 = arith.addf %52, %53 : vector<48x32xf32>
    %55 = arith.addf %6, %54 : vector<48x32xf32>
    %c0_26 = arith.constant 0 : index
    %c0_27 = arith.constant 0 : index
    %c0_28 = arith.constant 0 : index
    %56 = vector.load %arg14[%c0_26, %c0_27, %c0_28] : memref<2x1x32xf32, #tpu.memory_space<vmem>>, vector<1x1x32xf32>
    %57 = vector.shape_cast %56 : vector<1x1x32xf32> to vector<1x32xf32>
    %c0_29 = arith.constant 0 : index
    %c0_30 = arith.constant 0 : index
    %c0_31 = arith.constant 0 : index
    %58 = vector.load %arg15[%c0_29, %c0_30, %c0_31] : memref<2x1x32xf32, #tpu.memory_space<vmem>>, vector<1x1x32xf32>
    %59 = vector.shape_cast %58 : vector<1x1x32xf32> to vector<1x32xf32>
    %cst_32 = arith.constant dense<0.000000e+00> : vector<48xf32>
    %60 = vector.multi_reduction <add>, %55, %cst_32 [1] : vector<48x32xf32> to vector<48xf32>
    %61 = vector.shape_cast %60 : vector<48xf32> to vector<48x1xf32>
    %cst_33 = arith.constant 3.200000e+01 : f32
    %62 = vector.broadcast %cst_33 : f32 to vector<48x1xf32>
    %63 = arith.divf %61, %62 : vector<48x1xf32>
    %64 = vector.broadcast %63 : vector<48x1xf32> to vector<48x32xf32>
    %65 = arith.subf %55, %64 : vector<48x32xf32>
    %66 = arith.mulf %65, %65 : vector<48x32xf32>
    %cst_34 = arith.constant dense<0.000000e+00> : vector<48xf32>
    %67 = vector.multi_reduction <add>, %66, %cst_34 [1] : vector<48x32xf32> to vector<48xf32>
    %68 = vector.shape_cast %67 : vector<48xf32> to vector<48x1xf32>
    %cst_35 = arith.constant 3.200000e+01 : f32
    %69 = vector.broadcast %cst_35 : f32 to vector<48x1xf32>
    %70 = arith.divf %68, %69 : vector<48x1xf32>
    %cst_36 = arith.constant 9.99999974E-6 : f32
    %71 = vector.broadcast %cst_36 : f32 to vector<48x1xf32>
    %72 = arith.addf %70, %71 : vector<48x1xf32>
    %73 = math.rsqrt %72 : vector<48x1xf32>
    %74 = vector.broadcast %73 : vector<48x1xf32> to vector<48x32xf32>
    %75 = arith.mulf %65, %74 : vector<48x32xf32>
    %76 = vector.broadcast %57 : vector<1x32xf32> to vector<48x32xf32>
    %77 = arith.mulf %75, %76 : vector<48x32xf32>
    %78 = vector.broadcast %59 : vector<1x32xf32> to vector<48x32xf32>
    %79 = arith.addf %77, %78 : vector<48x32xf32>
    %c0_37 = arith.constant 0 : index
    %c0_38 = arith.constant 0 : index
    %c0_39 = arith.constant 0 : index
    %80 = vector.load %arg10[%c0_37, %c0_38, %c0_39] : memref<2x32x128xbf16, #tpu.memory_space<vmem>>, vector<1x32x128xbf16>
    %81 = vector.shape_cast %80 : vector<1x32x128xbf16> to vector<32x128xbf16>
    %c0_40 = arith.constant 0 : index
    %c0_41 = arith.constant 0 : index
    %c0_42 = arith.constant 0 : index
    %82 = vector.load %arg11[%c0_40, %c0_41, %c0_42] : memref<2x1x128xf32, #tpu.memory_space<vmem>>, vector<1x1x128xf32>
    %83 = vector.shape_cast %82 : vector<1x1x128xf32> to vector<1x128xf32>
    %84 = arith.truncf %79 : vector<48x32xf32> to vector<48x32xbf16>
    %cst_43 = arith.constant dense<0.000000e+00> : vector<48x128xf32>
    %85 = tpu.matmul %84, %81, %cst_43 {dimension_numbers = #tpu.dot_dimension_numbers<[1], [0], [0], [1], [0, 0, 1, 1], [], []>} : vector<48x32xbf16>, vector<32x128xbf16>, vector<48x128xf32> -> vector<48x128xf32>
    %86 = vector.broadcast %83 : vector<1x128xf32> to vector<48x128xf32>
    %87 = arith.addf %85, %86 : vector<48x128xf32>
    %cst_44 = arith.constant 0.000000e+00 : f32
    %88 = vector.broadcast %cst_44 : f32 to vector<48x128xf32>
    %89 = arith.maximumf %87, %88 : vector<48x128xf32>
    %c0_45 = arith.constant 0 : index
    %c0_46 = arith.constant 0 : index
    %c0_47 = arith.constant 0 : index
    %90 = vector.load %arg12[%c0_45, %c0_46, %c0_47] : memref<2x128x32xbf16, #tpu.memory_space<vmem>>, vector<1x128x32xbf16>
    %91 = vector.shape_cast %90 : vector<1x128x32xbf16> to vector<128x32xbf16>
    %c0_48 = arith.constant 0 : index
    %c0_49 = arith.constant 0 : index
    %c0_50 = arith.constant 0 : index
    %92 = vector.load %arg13[%c0_48, %c0_49, %c0_50] : memref<2x1x32xf32, #tpu.memory_space<vmem>>, vector<1x1x32xf32>
    %93 = vector.shape_cast %92 : vector<1x1x32xf32> to vector<1x32xf32>
    %94 = arith.truncf %89 : vector<48x128xf32> to vector<48x128xbf16>
    %cst_51 = arith.constant dense<0.000000e+00> : vector<48x32xf32>
    %95 = tpu.matmul %94, %91, %cst_51 {dimension_numbers = #tpu.dot_dimension_numbers<[1], [0], [0], [1], [0, 0, 1, 1], [], []>} : vector<48x128xbf16>, vector<128x32xbf16>, vector<48x32xf32> -> vector<48x32xf32>
    %96 = vector.broadcast %93 : vector<1x32xf32> to vector<48x32xf32>
    %97 = arith.addf %95, %96 : vector<48x32xf32>
    %98 = arith.addf %79, %97 : vector<48x32xf32>
    %c0_52 = arith.constant 0 : index
    %c0_53 = arith.constant 0 : index
    %c0_54 = arith.constant 0 : index
    %99 = vector.load %arg16[%c0_52, %c0_53, %c0_54] : memref<2x1x32xf32, #tpu.memory_space<vmem>>, vector<1x1x32xf32>
    %100 = vector.shape_cast %99 : vector<1x1x32xf32> to vector<1x32xf32>
    %c0_55 = arith.constant 0 : index
    %c0_56 = arith.constant 0 : index
    %c0_57 = arith.constant 0 : index
    %101 = vector.load %arg17[%c0_55, %c0_56, %c0_57] : memref<2x1x32xf32, #tpu.memory_space<vmem>>, vector<1x1x32xf32>
    %102 = vector.shape_cast %101 : vector<1x1x32xf32> to vector<1x32xf32>
    %cst_58 = arith.constant dense<0.000000e+00> : vector<48xf32>
    %103 = vector.multi_reduction <add>, %98, %cst_58 [1] : vector<48x32xf32> to vector<48xf32>
    %104 = vector.shape_cast %103 : vector<48xf32> to vector<48x1xf32>
    %cst_59 = arith.constant 3.200000e+01 : f32
    %105 = vector.broadcast %cst_59 : f32 to vector<48x1xf32>
    %106 = arith.divf %104, %105 : vector<48x1xf32>
    %107 = vector.broadcast %106 : vector<48x1xf32> to vector<48x32xf32>
    %108 = arith.subf %98, %107 : vector<48x32xf32>
    %109 = arith.mulf %108, %108 : vector<48x32xf32>
    %cst_60 = arith.constant dense<0.000000e+00> : vector<48xf32>
    %110 = vector.multi_reduction <add>, %109, %cst_60 [1] : vector<48x32xf32> to vector<48xf32>
    %111 = vector.shape_cast %110 : vector<48xf32> to vector<48x1xf32>
    %cst_61 = arith.constant 3.200000e+01 : f32
    %112 = vector.broadcast %cst_61 : f32 to vector<48x1xf32>
    %113 = arith.divf %111, %112 : vector<48x1xf32>
    %cst_62 = arith.constant 9.99999974E-6 : f32
    %114 = vector.broadcast %cst_62 : f32 to vector<48x1xf32>
    %115 = arith.addf %113, %114 : vector<48x1xf32>
    %116 = math.rsqrt %115 : vector<48x1xf32>
    %117 = vector.broadcast %116 : vector<48x1xf32> to vector<48x32xf32>
    %118 = arith.mulf %108, %117 : vector<48x32xf32>
    %119 = vector.broadcast %100 : vector<1x32xf32> to vector<48x32xf32>
    %120 = arith.mulf %118, %119 : vector<48x32xf32>
    %121 = vector.broadcast %102 : vector<1x32xf32> to vector<48x32xf32>
    %122 = arith.addf %120, %121 : vector<48x32xf32>
    %c1 = arith.constant 1 : index
    %c0_63 = arith.constant 0 : index
    %c0_64 = arith.constant 0 : index
    %123 = vector.load %arg6[%c1, %c0_63, %c0_64] : memref<2x32x96xbf16, #tpu.memory_space<vmem>>, vector<1x32x96xbf16>
    %124 = vector.shape_cast %123 : vector<1x32x96xbf16> to vector<32x96xbf16>
    %c1_65 = arith.constant 1 : index
    %c0_66 = arith.constant 0 : index
    %c0_67 = arith.constant 0 : index
    %125 = vector.load %arg7[%c1_65, %c0_66, %c0_67] : memref<2x1x96xf32, #tpu.memory_space<vmem>>, vector<1x1x96xf32>
    %126 = vector.shape_cast %125 : vector<1x1x96xf32> to vector<1x96xf32>
    %127 = arith.truncf %122 : vector<48x32xf32> to vector<48x32xbf16>
    %cst_68 = arith.constant dense<0.000000e+00> : vector<48x96xf32>
    %128 = tpu.matmul %127, %124, %cst_68 {dimension_numbers = #tpu.dot_dimension_numbers<[1], [0], [0], [1], [0, 0, 1, 1], [], []>} : vector<48x32xbf16>, vector<32x96xbf16>, vector<48x96xf32> -> vector<48x96xf32>
    %129 = vector.broadcast %126 : vector<1x96xf32> to vector<48x96xf32>
    %130 = arith.addf %128, %129 : vector<48x96xf32>
    %131 = vector.extract_strided_slice %130 {offsets = [0, 0], sizes = [48, 32], strides = [1, 1]} : vector<48x96xf32> to vector<48x32xf32>
    %132 = vector.extract_strided_slice %130 {offsets = [0, 32], sizes = [48, 32], strides = [1, 1]} : vector<48x96xf32> to vector<48x32xf32>
    %133 = vector.extract_strided_slice %130 {offsets = [0, 64], sizes = [48, 32], strides = [1, 1]} : vector<48x96xf32> to vector<48x32xf32>
    %134 = vector.extract_strided_slice %132 {offsets = [0, 0], sizes = [24, 32], strides = [1, 1]} : vector<48x32xf32> to vector<24x32xf32>
    %135 = vector.extract_strided_slice %132 {offsets = [24, 0], sizes = [24, 32], strides = [1, 1]} : vector<48x32xf32> to vector<24x32xf32>
    %136 = tpu.concatenate %134, %135 in 1 : vector<24x32xf32>, vector<24x32xf32> -> vector<24x64xf32>
    %137 = vector.extract_strided_slice %133 {offsets = [0, 0], sizes = [24, 32], strides = [1, 1]} : vector<48x32xf32> to vector<24x32xf32>
    %138 = vector.extract_strided_slice %133 {offsets = [24, 0], sizes = [24, 32], strides = [1, 1]} : vector<48x32xf32> to vector<24x32xf32>
    %139 = tpu.concatenate %137, %138 in 1 : vector<24x32xf32>, vector<24x32xf32> -> vector<24x64xf32>
    %140 = tpu.concatenate %136, %136 in 0 : vector<24x64xf32>, vector<24x64xf32> -> vector<48x64xf32>
    %141 = tpu.concatenate %139, %139 in 0 : vector<24x64xf32>, vector<24x64xf32> -> vector<48x64xf32>
    %142 = tpu.concatenate %131, %131 in 1 : vector<48x32xf32>, vector<48x32xf32> -> vector<48x64xf32>
    %143 = arith.mulf %142, %140 : vector<48x64xf32>
    %144 = arith.truncf %143 : vector<48x64xf32> to vector<48x64xbf16>
    %cst_69 = arith.constant dense<0.000000e+00> : vector<48x8xf32>
    %145 = tpu.matmul %144, %0, %cst_69 {dimension_numbers = #tpu.dot_dimension_numbers<[1], [0], [0], [1], [0, 0, 1, 1], [], []>} : vector<48x64xbf16>, vector<64x8xbf16>, vector<48x8xf32> -> vector<48x8xf32>
    %cst_70 = arith.constant 0.353553385 : f32
    %146 = vector.broadcast %cst_70 : f32 to vector<48x8xf32>
    %147 = arith.mulf %145, %146 : vector<48x8xf32>
    %148 = vector.extract_strided_slice %147 {offsets = [0, 0], sizes = [48, 4], strides = [1, 1]} : vector<48x8xf32> to vector<48x4xf32>
    %149 = vector.extract_strided_slice %147 {offsets = [0, 4], sizes = [48, 4], strides = [1, 1]} : vector<48x8xf32> to vector<48x4xf32>
    %150 = arith.maximumf %148, %149 : vector<48x4xf32>
    %151 = tpu.concatenate %150, %150 in 1 : vector<48x4xf32>, vector<48x4xf32> -> vector<48x8xf32>
    %152 = arith.subf %147, %151 : vector<48x8xf32>
    %153 = math.exp %152 : vector<48x8xf32>
    %154 = vector.extract_strided_slice %153 {offsets = [0, 0], sizes = [48, 4], strides = [1, 1]} : vector<48x8xf32> to vector<48x4xf32>
    %155 = vector.extract_strided_slice %153 {offsets = [0, 4], sizes = [48, 4], strides = [1, 1]} : vector<48x8xf32> to vector<48x4xf32>
    %156 = arith.addf %154, %155 : vector<48x4xf32>
    %157 = tpu.reciprocal %156 {approx = true} : vector<48x4xf32> -> vector<48x4xf32>
    %158 = tpu.concatenate %157, %157 in 1 : vector<48x4xf32>, vector<48x4xf32> -> vector<48x8xf32>
    %159 = arith.mulf %153, %158 : vector<48x8xf32>
    %160 = arith.truncf %159 : vector<48x8xf32> to vector<48x8xbf16>
    %cst_71 = arith.constant dense<0.000000e+00> : vector<48x64xf32>
    %161 = tpu.matmul %160, %1, %cst_71 {dimension_numbers = #tpu.dot_dimension_numbers<[1], [0], [0], [1], [0, 0, 1, 1], [], []>} : vector<48x8xbf16>, vector<8x64xbf16>, vector<48x64xf32> -> vector<48x64xf32>
    %162 = arith.mulf %161, %141 : vector<48x64xf32>
    %c1_72 = arith.constant 1 : index
    %c0_73 = arith.constant 0 : index
    %c0_74 = arith.constant 0 : index
    %163 = vector.load %arg8[%c1_72, %c0_73, %c0_74] : memref<2x64x32xbf16, #tpu.memory_space<vmem>>, vector<1x64x32xbf16>
    %164 = vector.shape_cast %163 : vector<1x64x32xbf16> to vector<64x32xbf16>
    %c1_75 = arith.constant 1 : index
    %c0_76 = arith.constant 0 : index
    %c0_77 = arith.constant 0 : index
    %165 = vector.load %arg9[%c1_75, %c0_76, %c0_77] : memref<2x1x32xf32, #tpu.memory_space<vmem>>, vector<1x1x32xf32>
    %166 = vector.shape_cast %165 : vector<1x1x32xf32> to vector<1x32xf32>
    %167 = arith.truncf %162 : vector<48x64xf32> to vector<48x64xbf16>
    %cst_78 = arith.constant dense<0.000000e+00> : vector<48x32xf32>
    %168 = tpu.matmul %167, %164, %cst_78 {dimension_numbers = #tpu.dot_dimension_numbers<[1], [0], [0], [1], [0, 0, 1, 1], [], []>} : vector<48x64xbf16>, vector<64x32xbf16>, vector<48x32xf32> -> vector<48x32xf32>
    %169 = vector.broadcast %166 : vector<1x32xf32> to vector<48x32xf32>
    %170 = arith.addf %168, %169 : vector<48x32xf32>
    %171 = arith.addf %122, %170 : vector<48x32xf32>
    %c1_79 = arith.constant 1 : index
    %c0_80 = arith.constant 0 : index
    %c0_81 = arith.constant 0 : index
    %172 = vector.load %arg14[%c1_79, %c0_80, %c0_81] : memref<2x1x32xf32, #tpu.memory_space<vmem>>, vector<1x1x32xf32>
    %173 = vector.shape_cast %172 : vector<1x1x32xf32> to vector<1x32xf32>
    %c1_82 = arith.constant 1 : index
    %c0_83 = arith.constant 0 : index
    %c0_84 = arith.constant 0 : index
    %174 = vector.load %arg15[%c1_82, %c0_83, %c0_84] : memref<2x1x32xf32, #tpu.memory_space<vmem>>, vector<1x1x32xf32>
    %175 = vector.shape_cast %174 : vector<1x1x32xf32> to vector<1x32xf32>
    %cst_85 = arith.constant dense<0.000000e+00> : vector<48xf32>
    %176 = vector.multi_reduction <add>, %171, %cst_85 [1] : vector<48x32xf32> to vector<48xf32>
    %177 = vector.shape_cast %176 : vector<48xf32> to vector<48x1xf32>
    %cst_86 = arith.constant 3.200000e+01 : f32
    %178 = vector.broadcast %cst_86 : f32 to vector<48x1xf32>
    %179 = arith.divf %177, %178 : vector<48x1xf32>
    %180 = vector.broadcast %179 : vector<48x1xf32> to vector<48x32xf32>
    %181 = arith.subf %171, %180 : vector<48x32xf32>
    %182 = arith.mulf %181, %181 : vector<48x32xf32>
    %cst_87 = arith.constant dense<0.000000e+00> : vector<48xf32>
    %183 = vector.multi_reduction <add>, %182, %cst_87 [1] : vector<48x32xf32> to vector<48xf32>
    %184 = vector.shape_cast %183 : vector<48xf32> to vector<48x1xf32>
    %cst_88 = arith.constant 3.200000e+01 : f32
    %185 = vector.broadcast %cst_88 : f32 to vector<48x1xf32>
    %186 = arith.divf %184, %185 : vector<48x1xf32>
    %cst_89 = arith.constant 9.99999974E-6 : f32
    %187 = vector.broadcast %cst_89 : f32 to vector<48x1xf32>
    %188 = arith.addf %186, %187 : vector<48x1xf32>
    %189 = math.rsqrt %188 : vector<48x1xf32>
    %190 = vector.broadcast %189 : vector<48x1xf32> to vector<48x32xf32>
    %191 = arith.mulf %181, %190 : vector<48x32xf32>
    %192 = vector.broadcast %173 : vector<1x32xf32> to vector<48x32xf32>
    %193 = arith.mulf %191, %192 : vector<48x32xf32>
    %194 = vector.broadcast %175 : vector<1x32xf32> to vector<48x32xf32>
    %195 = arith.addf %193, %194 : vector<48x32xf32>
    %c1_90 = arith.constant 1 : index
    %c0_91 = arith.constant 0 : index
    %c0_92 = arith.constant 0 : index
    %196 = vector.load %arg10[%c1_90, %c0_91, %c0_92] : memref<2x32x128xbf16, #tpu.memory_space<vmem>>, vector<1x32x128xbf16>
    %197 = vector.shape_cast %196 : vector<1x32x128xbf16> to vector<32x128xbf16>
    %c1_93 = arith.constant 1 : index
    %c0_94 = arith.constant 0 : index
    %c0_95 = arith.constant 0 : index
    %198 = vector.load %arg11[%c1_93, %c0_94, %c0_95] : memref<2x1x128xf32, #tpu.memory_space<vmem>>, vector<1x1x128xf32>
    %199 = vector.shape_cast %198 : vector<1x1x128xf32> to vector<1x128xf32>
    %200 = arith.truncf %195 : vector<48x32xf32> to vector<48x32xbf16>
    %cst_96 = arith.constant dense<0.000000e+00> : vector<48x128xf32>
    %201 = tpu.matmul %200, %197, %cst_96 {dimension_numbers = #tpu.dot_dimension_numbers<[1], [0], [0], [1], [0, 0, 1, 1], [], []>} : vector<48x32xbf16>, vector<32x128xbf16>, vector<48x128xf32> -> vector<48x128xf32>
    %202 = vector.broadcast %199 : vector<1x128xf32> to vector<48x128xf32>
    %203 = arith.addf %201, %202 : vector<48x128xf32>
    %cst_97 = arith.constant 0.000000e+00 : f32
    %204 = vector.broadcast %cst_97 : f32 to vector<48x128xf32>
    %205 = arith.maximumf %203, %204 : vector<48x128xf32>
    %c1_98 = arith.constant 1 : index
    %c0_99 = arith.constant 0 : index
    %c0_100 = arith.constant 0 : index
    %206 = vector.load %arg12[%c1_98, %c0_99, %c0_100] : memref<2x128x32xbf16, #tpu.memory_space<vmem>>, vector<1x128x32xbf16>
    %207 = vector.shape_cast %206 : vector<1x128x32xbf16> to vector<128x32xbf16>
    %c1_101 = arith.constant 1 : index
    %c0_102 = arith.constant 0 : index
    %c0_103 = arith.constant 0 : index
    %208 = vector.load %arg13[%c1_101, %c0_102, %c0_103] : memref<2x1x32xf32, #tpu.memory_space<vmem>>, vector<1x1x32xf32>
    %209 = vector.shape_cast %208 : vector<1x1x32xf32> to vector<1x32xf32>
    %210 = arith.truncf %205 : vector<48x128xf32> to vector<48x128xbf16>
    %cst_104 = arith.constant dense<0.000000e+00> : vector<48x32xf32>
    %211 = tpu.matmul %210, %207, %cst_104 {dimension_numbers = #tpu.dot_dimension_numbers<[1], [0], [0], [1], [0, 0, 1, 1], [], []>} : vector<48x128xbf16>, vector<128x32xbf16>, vector<48x32xf32> -> vector<48x32xf32>
    %212 = vector.broadcast %209 : vector<1x32xf32> to vector<48x32xf32>
    %213 = arith.addf %211, %212 : vector<48x32xf32>
    %214 = arith.addf %195, %213 : vector<48x32xf32>
    %c1_105 = arith.constant 1 : index
    %c0_106 = arith.constant 0 : index
    %c0_107 = arith.constant 0 : index
    %215 = vector.load %arg16[%c1_105, %c0_106, %c0_107] : memref<2x1x32xf32, #tpu.memory_space<vmem>>, vector<1x1x32xf32>
    %216 = vector.shape_cast %215 : vector<1x1x32xf32> to vector<1x32xf32>
    %c1_108 = arith.constant 1 : index
    %c0_109 = arith.constant 0 : index
    %c0_110 = arith.constant 0 : index
    %217 = vector.load %arg17[%c1_108, %c0_109, %c0_110] : memref<2x1x32xf32, #tpu.memory_space<vmem>>, vector<1x1x32xf32>
    %218 = vector.shape_cast %217 : vector<1x1x32xf32> to vector<1x32xf32>
    %cst_111 = arith.constant dense<0.000000e+00> : vector<48xf32>
    %219 = vector.multi_reduction <add>, %214, %cst_111 [1] : vector<48x32xf32> to vector<48xf32>
    %220 = vector.shape_cast %219 : vector<48xf32> to vector<48x1xf32>
    %cst_112 = arith.constant 3.200000e+01 : f32
    %221 = vector.broadcast %cst_112 : f32 to vector<48x1xf32>
    %222 = arith.divf %220, %221 : vector<48x1xf32>
    %223 = vector.broadcast %222 : vector<48x1xf32> to vector<48x32xf32>
    %224 = arith.subf %214, %223 : vector<48x32xf32>
    %225 = arith.mulf %224, %224 : vector<48x32xf32>
    %cst_113 = arith.constant dense<0.000000e+00> : vector<48xf32>
    %226 = vector.multi_reduction <add>, %225, %cst_113 [1] : vector<48x32xf32> to vector<48xf32>
    %227 = vector.shape_cast %226 : vector<48xf32> to vector<48x1xf32>
    %cst_114 = arith.constant 3.200000e+01 : f32
    %228 = vector.broadcast %cst_114 : f32 to vector<48x1xf32>
    %229 = arith.divf %227, %228 : vector<48x1xf32>
    %cst_115 = arith.constant 9.99999974E-6 : f32
    %230 = vector.broadcast %cst_115 : f32 to vector<48x1xf32>
    %231 = arith.addf %229, %230 : vector<48x1xf32>
    %232 = math.rsqrt %231 : vector<48x1xf32>
    %233 = vector.broadcast %232 : vector<48x1xf32> to vector<48x32xf32>
    %234 = arith.mulf %224, %233 : vector<48x32xf32>
    %235 = vector.broadcast %216 : vector<1x32xf32> to vector<48x32xf32>
    %236 = arith.mulf %234, %235 : vector<48x32xf32>
    %237 = vector.broadcast %218 : vector<1x32xf32> to vector<48x32xf32>
    %238 = arith.addf %236, %237 : vector<48x32xf32>
    %c0_116 = arith.constant 0 : index
    %c0_117 = arith.constant 0 : index
    %239 = vector.load %arg5[%c0_116, %c0_117] : memref<2x48xf32, #tpu.memory_space<vmem>>, vector<2x48xf32>
    %cst_118 = arith.constant dense<0.000000e+00> : vector<2x32xf32>
    %240 = tpu.matmul %239, %238, %cst_118 {dimension_numbers = #tpu.dot_dimension_numbers<[1], [0], [0], [1], [0, 0, 1, 1], [], []>} : vector<2x48xf32>, vector<48x32xf32>, vector<2x32xf32> -> vector<2x32xf32>
    %c0_119 = arith.constant 0 : index
    %c0_120 = arith.constant 0 : index
    %241 = vector.load %arg18[%c0_119, %c0_120] : memref<32x16xbf16, #tpu.memory_space<vmem>>, vector<32x16xbf16>
    %c0_121 = arith.constant 0 : index
    %c0_122 = arith.constant 0 : index
    %242 = vector.load %arg19[%c0_121, %c0_122] : memref<1x16xf32, #tpu.memory_space<vmem>>, vector<1x16xf32>
    %243 = arith.truncf %240 : vector<2x32xf32> to vector<2x32xbf16>
    %cst_123 = arith.constant dense<0.000000e+00> : vector<2x16xf32>
    %244 = tpu.matmul %243, %241, %cst_123 {dimension_numbers = #tpu.dot_dimension_numbers<[1], [0], [0], [1], [0, 0, 1, 1], [], []>} : vector<2x32xbf16>, vector<32x16xbf16>, vector<2x16xf32> -> vector<2x16xf32>
    %245 = vector.broadcast %242 : vector<1x16xf32> to vector<2x16xf32>
    %246 = arith.addf %244, %245 : vector<2x16xf32>
    %c0_124 = arith.constant 0 : index
    %c0_125 = arith.constant 0 : index
    %247 = vector.load %arg20[%c0_124, %c0_125] : memref<2x16xf32, #tpu.memory_space<vmem>>, vector<2x16xf32>
    tpu.vector_store %arg20[%c0_124, %c0_125], %246 {strides = array<i32>} : memref<2x16xf32, #tpu.memory_space<vmem>>, vector<2x16xf32>,
    return
  }
}

</mosaic_0001>

<bundles_post_ra>
// kernel: vit_encoder_forward.1
= control target key start
LH: loop header
LB: loop body
LE: loop exit
PB: predicated region body
PF: predicated region fallthrough
CT: control target
= control target key end

     0   :  { %s4159_s0 = inlined_call_operand.vmem [shape: bf16[48,128], index: 0, kind: input, shape index: {}]   ;;  %s4160_s1 = inlined_call_operand.vmem [shape: bf16[128,32], index: 1, kind: input, shape index: {}]   ;;  %s4161_s2 = inlined_call_operand.vmem [shape: f32[48,32], index: 2, kind: input, shape index: {}]   ;;  %s4162_s3 = inlined_call_operand.vmem [shape: bf16[64,8], index: 3, kind: input, shape index: {}]   ;;  %s4163_s4 = inlined_call_operand.vmem [shape: bf16[8,64], index: 4, kind: input, shape index: {}]   ;;  %s4164_s5 = inlined_call_operand.vmem [shape: f32[2,48], index: 5, kind: input, shape index: {}]   ;;  %s4165_s6 = inlined_call_operand.vmem [shape: bf16[2,32,96], index: 6, kind: input, shape index: {}]   ;;  %s4166_s7 = inlined_call_operand.vmem [shape: f32[2,1,96], index: 7, kind: input, shape index: {}]   ;;  %s4167_s8 = inlined_call_operand.vmem [shape: bf16[2,64,32], index: 8, kind: input, shape index: {}]   ;;  %s4168_s9 = inlined_call_operand.vmem [shape: f32[2,1,32], index: 9, kind: input, shape index: {}]   ;;  %s4169_s10 = inlined_call_operand.vmem [shape: bf16[2,32,128], index: 10, kind: input, shape index: {}]   ;;  %s4170_s11 = inlined_call_operand.vmem [shape: f32[2,1,128], index: 11, kind: input, shape index: {}]   ;;  %s4171_s12 = inlined_call_operand.vmem [shape: bf16[2,128,32], index: 12, kind: input, shape index: {}]   ;;  %s4172_s13 = inlined_call_operand.vmem [shape: f32[2,1,32], index: 13, kind: input, shape index: {}]   ;;  %s4173_s14 = inlined_call_operand.vmem [shape: f32[2,1,32], index: 14, kind: input, shape index: {}]   ;;  %s4174_s15 = inlined_call_operand.vmem [shape: f32[2,1,32], index: 15, kind: input, shape index: {}]   ;;  %s4175_s16 = inlined_call_operand.vmem [shape: f32[2,1,32], index: 16, kind: input, shape index: {}]   ;;  %s4176_s17 = inlined_call_operand.vmem [shape: f32[2,1,32], index: 17, kind: input, shape index: {}]   ;;  %s4177_s18 = inlined_call_operand.vmem [shape: bf16[32,16], index: 18, kind: input, shape index: {}]   ;;  %s4178_s19 = inlined_call_operand.vmem [shape: f32[1,16], index: 19, kind: input, shape index: {}]   ;;  %s4179_s20 = inlined_call_operand.hbm [shape: f32[2,16], index: 20, kind: output, shape index: {}]  }
   0x1   :  { %4184 = sst [smem:[#allocation5_spill]] %s4159_s0 }
   0x2   :  { %4185 = sst [smem:[#allocation6_spill]] %s4160_s1 }
   0x3   :  { %4186 = sst [smem:[#allocation7_spill]] %s4161_s2 }
   0x4   :  { %4187 = sst [smem:[#allocation8_spill]] %s4162_s3 }
   0x5   :  { %4188 = sst [smem:[#allocation9_spill]] %s4163_s4 }
   0x6   :  { %s4189_s23 = sld [smem:[#allocation6_spill]]  ;;  %v3157_v1 = vmov 0.0   ;;  %vm3158_vm0 = vmmov 0  }
   0x7   :  { %2703 = vmatprep.subr.bf16.mxu0 %v3157_v1  ;;  %2731 = vmatprep.subr.bf16.mxu1 %v3157_v1  ;;  %s4190_s25 = sld [smem:[#allocation5_spill]] }
   0x8   :  { %2719 = vmatprep.mubr.msk.bf16.mxu0 %vm3158_vm0, %v3157_v1  ;;  %2735 = vmatprep.mubr.msk.bf16.mxu1 %vm3158_vm0, %v3157_v1 }
   0xc   :  { %v2990_v0 = vld [vmem:[%s4189_s23 + $0x38] sm:$0xff]   ;;  %v2991_v2 = vld [vmem:[%s4189_s23 + $0x30] sm:$0xff]   ;;  %v2992_v3 = vld [vmem:[%s4189_s23 + $0x28] sm:$0xff]  }
   0xd   :  { %2704 = vmatpush3.bf16.msra.mxu0 %v2990_v0  ;;  %v2993_v4 = vld [vmem:[%s4189_s23 + $0x20] sm:$0xff]   ;;  %v2994_v5 = vld [vmem:[%s4189_s23 + $0x18] sm:$0xff]   ;;  %v2995_v6 = vld [vmem:[%s4189_s23 + $0x10] sm:$0xff]  }
   0xe   :  { %2705 = vmatprep.subr.bf16.mxu0 %v3157_v1  ;;  %v2996_v7 = vld [vmem:[%s4189_s23 + $0x8] sm:$0xff]   ;;  %v2997_v8 = vld [vmem:[%s4189_s23] sm:$0xff]  }
   0xf   :  { %v2998_v9 = vld [vmem:[%s4190_s25] sm:$0xff]  }
  0x11   :  { %2706 = vmatpush3.bf16.msra.mxu0 %v2991_v2 }
  0x12   :  { %2707 = vmatprep.subr.bf16.mxu0 %v3157_v1 }
  0x15   :  { %2708 = vmatpush3.bf16.msra.mxu0 %v2992_v3 }
  0x16   :  { %2709 = vmatprep.subr.bf16.mxu0 %v3157_v1 }
  0x19   :  { %2710 = vmatpush3.bf16.msra.mxu0 %v2993_v4 }
  0x1a   :  { %2711 = vmatprep.subr.bf16.mxu0 %v3157_v1 }
  0x1d   :  { %2712 = vmatpush3.bf16.msra.mxu0 %v2994_v5 }
  0x1e   :  { %2713 = vmatprep.subr.bf16.mxu0 %v3157_v1 }
  0x21   :  { %2714 = vmatpush3.bf16.msra.mxu0 %v2995_v6 }
  0x22   :  { %2715 = vmatprep.subr.bf16.mxu0 %v3157_v1 }
  0x25   :  { %2716 = vmatpush3.bf16.msra.mxu0 %v2996_v7 }
  0x26   :  { %2717 = vmatprep.subr.bf16.mxu0 %v3157_v1 }
  0x29   :  { %2718 = vmatpush3.bf16.msra.mxu0 %v2997_v8 }
  0x2a   :  { %2767 = vmatprep.subr.bf16.mxu0 %v3157_v1 }
  0x2c   :  { %2720 = vmatmul.mubr.bf16.vlgmr.msra.gmra.mxu0 %v2998_v9 }
  0x2d   :  { %2723 = vmatprep.mubr.msk.bf16.mxu0 %vm3158_vm0, %v3157_v1 }
  0x2e   :  { %25 = vsyncpa [#allocation3], 0  ;;  %v2999_v10 = vld [vmem:[%s4190_s25 + $0x8] sm:$0xff]   ;;  %v3000_v11 = vld [vmem:[%s4190_s25 + $0x10] sm:$0xff]   ;;  %s4191_s1 = sld [smem:[#allocation7_spill]]  ;;  %vm253_vm1 = vcmask 261120  }
  0x2f   :  { %v3001_v12 = vld [vmem:[%s4165_s6 + $0x8] sm:$0xff]   ;;  %v3002_v13 = vld [vmem:[%s4165_s6] sm:$0xff]   ;;  %s4192_s0 = sld [smem:[#allocation8_spill]]  ;;  %s3159_s23 = smov 32   ;;  %vm416_vm2 = vcmask 523264   ;;  %vm543_vm3 = vcmask 31744  }
  0x30   :  { %2732 = vmatpush3.bf16.msra.mxu1 %v3001_v12  ;;  %v2477_v45 = vld [vmem:[%s4166_s7] ss:$0 sm:$0xff]  ;;  %s3160_s27 = smov 96   ;;  %s3161_s28 = smov 124   ;;  %vm653_vm4 = vcmask 1043456   ;;  %vm643_vm5 = vcmask 64512  }
  0x31   :  { %2733 = vmatprep.subr.bf16.mxu1 %v3157_v1  ;;  %s3162_s4 = smov 4   ;;  %s3163_s22 = smov 64   ;;  %vm2309_vm6 = vcmask 392192   ;;  %vm2450_vm7 = vcmask 123904  }
  0x34   :  { %2724 = vmatmul.mubr.bf16.gmra.mxu0 %v2999_v10  ;;  %2734 = vmatpush3.bf16.msra.mxu1 %v3002_v13  ;;  %v98_v15 = vld [vmem:[%s4191_s1] sm:$0xff]  ;;  %v99_v17 = vld [vmem:[%s4191_s1 + $0x8] sm:$0xff]  ;;  %v100_v24 = vld [vmem:[%s4191_s1 + $0x10] sm:$0xff] }
  0x35   :  { %2727 = vmatprep.mubr.msk.bf16.mxu0 %vm3158_vm0, %v3157_v1  ;;  %2747 = vmatprep.subr.bf16.mxu1 %v3157_v1  ;;  %v101_v26 = vld [vmem:[%s4191_s1 + $0x18] sm:$0xff]  ;;  %v102_v33 = vld [vmem:[%s4191_s1 + $0x20] sm:$0xff]  ;;  %v103_v35 = vld [vmem:[%s4191_s1 + $0x28] sm:$0xff] }
  0x36   :  { %v3379_v41 = vld [vmem:[%s4192_s0 + $0x18] sm:$0xff]   ;;  %v3385_v42 = vld [vmem:[%s4192_s0 + $0x10] sm:$0xff]   ;;  %v3393_v43 = vld [vmem:[%s4192_s0 + $0x8] sm:$0xff]  }
  0x37   :  { %v3400_v44 = vld [vmem:[%s4192_s0] sm:$0xff]   ;;  %s4193_s0 = sld [smem:[#allocation9_spill]] }
  0x3c   :  { %2728 = vmatmul.mubr.bf16.gmra.mxu0 %v3000_v11 }
  0x3d   :  { %2769 = vmatprep.mubr.msk.bf16.mxu0 %vm3158_vm0, %v3157_v1 }
  0xec   :  { %v204_v14 = vpop.f32.mrf.mxu0 }
  0xed   :  { %v3337_v19 = vadd.f32 %v204_v14, %v98_v15 }
  0xee   :  { %v2721_v16 = vpop.f32.mrf.mxu0 }
  0xf0   :  { %v207_v18 = vpop.f32.mrf.mxu0 }
  0xf1   :  { %v3339_v20 = vadd.f32 %v207_v18, %v99_v17 }
  0xf2   :  { %v2722_v21 = vpop.f32.mrf.mxu0 }
  0xf3   :  { %v232_v22 = vpack.c.bf16 %v3339_v20, %v3337_v19 }
  0xf4   :  { %v212_v23 = vpop.f32.mrf.mxu0 }
  0xf5   :  { %2736 = vmatmul.mubr.msk.bf16.vlgmr.msra.gmra.mxu1 %vm253_vm1, %v232_v22  ;;  %v3352_v28 = vadd.f32 %v212_v23, %v100_v24 }
  0xf6   :  { %v2725_v25 = vpop.f32.mrf.mxu0  ;;  %2739 = vmatprep.mubr.msk.bf16.mxu1 %vm3158_vm0, %v3157_v1  ;;  %2748 = vmatpush3.bf16.msra.mxu1 %v3379_v41 }
  0xf7   :  { %2749 = vmatprep.subr.bf16.mxu1 %v3157_v1 }
  0xf8   :  { %v215_v27 = vpop.f32.mrf.mxu0 }
  0xf9   :  { %v3354_v29 = vadd.f32 %v215_v27, %v101_v26 }
  0xfa   :  { %v2726_v30 = vpop.f32.mrf.mxu0  ;;  %2750 = vmatpush3.bf16.msra.mxu1 %v3385_v42 }
  0xfb   :  { %v233_v31 = vpack.c.bf16 %v3354_v29, %v3352_v28  ;;  %2751 = vmatprep.subr.bf16.mxu1 %v3157_v1 }
  0xfc   :  { %v220_v32 = vpop.f32.mrf.mxu0 }
  0xfd   :  { %2740 = vmatmul.mubr.msk.bf16.gmra.mxu1 %vm253_vm1, %v233_v31  ;;  %v3367_v37 = vadd.f32 %v220_v32, %v102_v33 }
  0xfe   :  { %v2729_v34 = vpop.f32.mrf.mxu0  ;;  %2743 = vmatprep.mubr.msk.bf16.mxu1 %vm3158_vm0, %v3157_v1  ;;  %2752 = vmatpush3.bf16.msra.mxu1 %v3393_v43 }
  0xff   :  { %2753 = vmatprep.subr.bf16.mxu1 %v3157_v1 }
 0x100   :  { %v223_v36 = vpop.f32.mrf.mxu0 }
 0x101   :  { %v3369_v38 = vadd.f32 %v223_v36, %v103_v35 }
 0x102   :  { %v2730_v39 = vpop.f32.mrf.mxu0  ;;  %2754 = vmatpush3.bf16.msra.mxu1 %v3400_v44 }
 0x103   :  { %v234_v40 = vpack.c.bf16 %v3369_v38, %v3367_v37  ;;  %2781 = vmatprep.subr.bf16.mxu1 %v3157_v1 }
 0x105   :  { %2744 = vmatmul.mubr.msk.bf16.gmra.mxu1 %vm253_vm1, %v234_v40 }
 0x106   :  { %2755 = vmatprep.mubr.msk.bf16.mxu1 %vm3158_vm0, %v3157_v1 }
 0x1b5   :  { %v297_v46 = vpop.f32.mrf.mxu1 }
 0x1b6   :  { %v3407_v47 = vadd.f32 %v2477_v45, %v297_v46 }
 0x1b7   :  { %v2737_v48 = vpop.f32.mrf.mxu1 }
 0x1b8   :  { %359 = vrot.lane.b32.xlu1 %v3407_v47, %s3159_s23  ;;  %323 = vrot.lane.b32.xlu0 %v3407_v47, %s3160_s27 }
 0x1b9   :  { %v300_v49 = vpop.f32.mrf.mxu1 }
 0x1ba   :  { %v3413_v50 = vadd.f32 %v2477_v45, %v300_v49 }
 0x1bb   :  { %v2738_v51 = vpop.f32.mrf.mxu1 }
 0x1bc   :  { %361 = vrot.lane.b32.xlu1 %v3413_v50, %s3159_s23  ;;  %325 = vrot.lane.b32.xlu0 %v3413_v50, %s3160_s27 }
 0x1bd   :  { %v305_v52 = vpop.f32.mrf.mxu1 }
 0x1be   :  { %v3419_v53 = vadd.f32 %v2477_v45, %v305_v52 }
 0x1bf   :  { %v2741_v54 = vpop.f32.mrf.mxu1 }
 0x1c0   :  { %363 = vrot.lane.b32.xlu1 %v3419_v53, %s3159_s23  ;;  %327 = vrot.lane.b32.xlu0 %v3419_v53, %s3160_s27 }
 0x1c1   :  { %v308_v55 = vpop.f32.mrf.mxu1 }
 0x1c2   :  { %v3425_v56 = vadd.f32 %v2477_v45, %v308_v55 }
 0x1c3   :  { %v2742_v57 = vpop.f32.mrf.mxu1 }
 0x1c4   :  { %365 = vrot.lane.b32.xlu0 %v3425_v56, %s3159_s23 }
 0x1c5   :  { %v313_v58 = vpop.f32.mrf.mxu1 }
 0x1c6   :  { %v3429_v59 = vadd.f32 %v2477_v45, %v313_v58 }
 0x1c7   :  { %v2745_v60 = vpop.f32.mrf.mxu1 }
 0x1c8   :  { %367 = vrot.lane.b32.xlu1 %v3429_v59, %s3159_s23 }
 0x1c9   :  { %v316_v61 = vpop.f32.mrf.mxu1 }
 0x1ca   :  { %v3433_v62 = vadd.f32 %v2477_v45, %v316_v61 }
 0x1cb   :  { %v2746_v63 = vpop.f32.mrf.mxu1 }
 0x1cc   :  { %369 = vrot.lane.b32.xlu0 %v3433_v62, %s3159_s23 }
 0x22a   :  { %v360_v0 = vpop.permute.xlu1 %359  ;;  %v324_v2 = vpop.permute.xlu0 %323 }
 0x22b   :  { %v377_v3 = vsel %vm253_vm1, %v3407_v47, %v360_v0  ;;  %v332_v4 = vsel %vm253_vm1, %v324_v2, %v3425_v56 }
 0x22c   :  { %v383_v9 = vmul.f32 %v377_v3, %v332_v4 }
 0x22e   :  { %v362_v5 = vpop.permute.xlu1 %361  ;;  %v326_v6 = vpop.permute.xlu0 %325 }
 0x22f   :  { %v378_v7 = vsel %vm253_vm1, %v3413_v50, %v362_v5  ;;  %v333_v8 = vsel %vm253_vm1, %v326_v6, %v3429_v59 }
 0x230   :  { %v384_v10 = vmul.f32 %v378_v7, %v333_v8 }
 0x232   :  { %v389_v11 = vpack.c.bf16 %v384_v10, %v383_v9  ;;  %v364_v12 = vpop.permute.xlu1 %363  ;;  %v328_v13 = vpop.permute.xlu0 %327 }
 0x233   :  { %v379_v14 = vsel %vm253_vm1, %v3419_v53, %v364_v12  ;;  %v334_v15 = vsel %vm253_vm1, %v328_v13, %v3433_v62 }
 0x234   :  { %2756 = vmatmul.mubr.msk.bf16.vlgmr.msra.gmra.mxu1 %vm416_vm2, %v389_v11  ;;  %v385_v18 = vmul.f32 %v379_v14, %v334_v15 }
 0x235   :  { %2759 = vmatprep.mubr.msk.bf16.mxu1 %vm3158_vm0, %v3157_v1 }
 0x236   :  { %v366_v16 = vpop.permute.xlu0 %365 }
 0x237   :  { %v380_v17 = vsel %vm253_vm1, %v3425_v56, %v366_v16 }
 0x238   :  { %v386_v21 = vmul.f32 %v380_v17, %v332_v4 }
 0x23a   :  { %v390_v22 = vpack.c.bf16 %v386_v21, %v385_v18  ;;  %v368_v23 = vpop.permute.xlu1 %367 }
 0x23b   :  { %v381_v24 = vsel %vm253_vm1, %v3429_v59, %v368_v23 }
 0x23c   :  { %2760 = vmatmul.mubr.msk.bf16.gmra.mxu1 %vm416_vm2, %v390_v22  ;;  %v387_v27 = vmul.f32 %v381_v24, %v333_v8 }
 0x23d   :  { %2763 = vmatprep.mubr.msk.bf16.mxu1 %vm3158_vm0, %v3157_v1 }
 0x23e   :  { %v370_v25 = vpop.permute.xlu0 %369 }
 0x23f   :  { %v382_v26 = vsel %vm253_vm1, %v3433_v62, %v370_v25 }
 0x240   :  { %v388_v30 = vmul.f32 %v382_v26, %v334_v15 }
 0x242   :  { %v391_v31 = vpack.c.bf16 %v388_v30, %v387_v27 }
 0x244   :  { %2764 = vmatmul.mubr.msk.bf16.gmra.mxu1 %vm416_vm2, %v391_v31 }
 0x245   :  { %2789 = vmatprep.mubr.msk.bf16.mxu1 %vm3158_vm0, %v3157_v1 }
 0x2f4   :  { %v460_v32 = vpop.f32.mrf.mxu1 }
 0x2f5   :  { %v483_v33 = vmul.f32 0.35355338, %v460_v32 }
 0x2f6   :  { %v2757_v34 = vpop.f32.mrf.mxu1 }
 0x2f7   :  { %495 = vrot.lane.b32.xlu1 %v483_v33, %s3161_s28 }
 0x2f8   :  { %v463_v35 = vpop.f32.mrf.mxu1 }
 0x2f9   :  { %v484_v36 = vmul.f32 0.35355338, %v463_v35 }
 0x2fa   :  { %v2758_v39 = vpop.f32.mrf.mxu1 }
 0x2fb   :  { %497 = vrot.lane.b32.xlu0 %v484_v36, %s3161_s28 }
 0x2fc   :  { %v468_v40 = vpop.f32.mrf.mxu1 }
 0x2fd   :  { %v485_v45 = vmul.f32 0.35355338, %v468_v40 }
 0x2fe   :  { %v2761_v46 = vpop.f32.mrf.mxu1 }
 0x2ff   :  { %499 = vrot.lane.b32.xlu1 %v485_v45, %s3161_s28 }
 0x300   :  { %v471_v48 = vpop.f32.mrf.mxu1 }
 0x301   :  { %v486_v49 = vmul.f32 0.35355338, %v471_v48 }
 0x302   :  { %v2762_v51 = vpop.f32.mrf.mxu1 }
 0x303   :  { %501 = vrot.lane.b32.xlu0 %v486_v49, %s3161_s28 }
 0x304   :  { %v476_v52 = vpop.f32.mrf.mxu1 }
 0x305   :  { %v487_v54 = vmul.f32 0.35355338, %v476_v52 }
 0x306   :  { %v2765_v55 = vpop.f32.mrf.mxu1 }
 0x307   :  { %503 = vrot.lane.b32.xlu1 %v487_v54, %s3161_s28 }
 0x308   :  { %v479_v57 = vpop.f32.mrf.mxu1 }
 0x309   :  { %v488_v58 = vmul.f32 0.35355338, %v479_v57 }
 0x30a   :  { %v2766_v60 = vpop.f32.mrf.mxu1 }
 0x30b   :  { %505 = vrot.lane.b32.xlu0 %v488_v58, %s3161_s28 }
 0x369   :  { %v496_v61 = vpop.permute.xlu1 %495 }
 0x36a   :  { %v513_v63 = vmax.f32 %v483_v33, %v496_v61 }
 0x36c   :  { %525 = vrot.lane.b32.xlu1 %v513_v63, %s3162_s4 }
 0x36d   :  { %v498_v0 = vpop.permute.xlu0 %497 }
 0x36e   :  { %v514_v2 = vmax.f32 %v484_v36, %v498_v0 }
 0x370   :  { %527 = vrot.lane.b32.xlu0 %v514_v2, %s3162_s4 }
 0x371   :  { %v500_v3 = vpop.permute.xlu1 %499 }
 0x372   :  { %v515_v4 = vmax.f32 %v485_v45, %v500_v3 }
 0x374   :  { %529 = vrot.lane.b32.xlu1 %v515_v4, %s3162_s4 }
 0x375   :  { %v502_v5 = vpop.permute.xlu0 %501 }
 0x376   :  { %v516_v6 = vmax.f32 %v486_v49, %v502_v5 }
 0x378   :  { %531 = vrot.lane.b32.xlu0 %v516_v6, %s3162_s4 }
 0x379   :  { %v504_v7 = vpop.permute.xlu1 %503 }
 0x37a   :  { %v517_v8 = vmax.f32 %v487_v54, %v504_v7 }
 0x37c   :  { %533 = vrot.lane.b32.xlu1 %v517_v8, %s3162_s4 }
 0x37d   :  { %v506_v9 = vpop.permute.xlu0 %505 }
 0x37e   :  { %v518_v10 = vmax.f32 %v488_v58, %v506_v9 }
 0x380   :  { %535 = vrot.lane.b32.xlu0 %v518_v10, %s3162_s4 }
 0x3de   :  { %v526_v11 = vpop.permute.xlu1 %525 }
 0x3df   :  { %v544_v12 = vsel %vm543_vm3, %v513_v63, %v526_v11 }
 0x3e0   :  { %v550_v13 = vsub.f32 %v483_v33, %v544_v12 }
 0x3e2   :  { %v556_v14 = vmul.f32 1.442695, %v550_v13  ;;  %v528_v15 = vpop.permute.xlu0 %527  ;;  %v3007_v13 = vld [vmem:[%s4167_s8 + $0x18] sm:$0xff]  }
 0x3e3   :  { %v545_v16 = vsel %vm543_vm3, %v514_v2, %v528_v15  ;;  %2782 = vmatpush3.bf16.msra.mxu1 %v3007_v13  ;;  %v3008_v15 = vld [vmem:[%s4167_s8 + $0x10] sm:$0xff]  }
 0x3e4   :  { %3039 = vpow2.f32 %v556_v14  ;;  %v551_v17 = vsub.f32 %v484_v36, %v545_v16  ;;  %2783 = vmatprep.subr.bf16.mxu1 %v3157_v1 }
 0x3e6   :  { %v558_v18 = vmul.f32 1.442695, %v551_v17  ;;  %v530_v21 = vpop.permute.xlu1 %529 }
 0x3e7   :  { %v546_v22 = vsel %vm543_vm3, %v515_v4, %v530_v21  ;;  %2784 = vmatpush3.bf16.msra.mxu1 %v3008_v15 }
 0x3e8   :  { %3041 = vpow2.f32 %v558_v18  ;;  %v552_v23 = vsub.f32 %v485_v45, %v546_v22  ;;  %2785 = vmatprep.subr.bf16.mxu1 %v3157_v1 }
 0x3ea   :  { %v560_v24 = vmul.f32 1.442695, %v552_v23  ;;  %v532_v25 = vpop.permute.xlu0 %531 }
 0x3eb   :  { %v547_v26 = vsel %vm543_vm3, %v516_v6, %v532_v25 }
 0x3ec   :  { %3043 = vpow2.f32 %v560_v24  ;;  %v553_v27 = vsub.f32 %v486_v49, %v547_v26 }
 0x3ee   :  { %v562_v30 = vmul.f32 1.442695, %v553_v27  ;;  %v534_v31 = vpop.permute.xlu1 %533 }
 0x3ef   :  { %v548_v32 = vsel %vm543_vm3, %v517_v8, %v534_v31 }
 0x3f0   :  { %3045 = vpow2.f32 %v562_v30  ;;  %v554_v33 = vsub.f32 %v487_v54, %v548_v32  ;;  %v75_v54 = vld [vmem:[%s4193_s0] sm:$0xf] }
 0x3f1   :  { %v3481_v34 = vpop.eup %3039  ;;  %v3509_v55 = vsel %vm653_vm4, %v75_v54, 0 }
 0x3f2   :  { %v564_v35 = vmul.f32 1.442695, %v554_v33  ;;  %574 = vrot.lane.b32.xlu1 %v3481_v34, %s3161_s28  ;;  %v536_v36 = vpop.permute.xlu0 %535  ;;  %2768 = vmatpush3.bf16.msra.mxu0 %v3509_v55 }
 0x3f3   :  { %v549_v39 = vsel %vm543_vm3, %v518_v10, %v536_v36  ;;  %2801 = vmatprep.subr.bf16.mxu0 %v3157_v1  ;;  %v3010_v36 = vld [vmem:[%s4167_s8] sm:$0xff]  }
 0x3f4   :  { %3047 = vpow2.f32 %v564_v35  ;;  %v555_v40 = vsub.f32 %v488_v58, %v549_v39  ;;  %v3009_v35 = vld [vmem:[%s4167_s8 + $0x8] sm:$0xff]  }
 0x3f5   :  { %v3486_v45 = vpop.eup %3041  ;;  %2786 = vmatpush3.bf16.msra.mxu1 %v3009_v35 }
 0x3f6   :  { %v566_v46 = vmul.f32 1.442695, %v555_v40  ;;  %576 = vrot.lane.b32.xlu0 %v3486_v45, %s3161_s28  ;;  %2787 = vmatprep.subr.bf16.mxu1 %v3157_v1 }
 0x3f8   :  { %3049 = vpow2.f32 %v566_v46 }
 0x3f9   :  { %v3490_v48 = vpop.eup %3043  ;;  %2788 = vmatpush3.bf16.msra.mxu1 %v3010_v36 }
 0x3fa   :  { %578 = vrot.lane.b32.xlu1 %v3490_v48, %s3161_s28  ;;  %2817 = vmatprep.subr.bf16.mxu1 %v3157_v1 }
 0x3fd   :  { %v3494_v49 = vpop.eup %3045 }
 0x3fe   :  { %580 = vrot.lane.b32.xlu0 %v3494_v49, %s3161_s28 }
 0x401   :  { %v3498_v51 = vpop.eup %3047 }
 0x402   :  { %582 = vrot.lane.b32.xlu1 %v3498_v51, %s3161_s28 }
 0x405   :  { %v3502_v52 = vpop.eup %3049 }
 0x406   :  { %584 = vrot.lane.b32.xlu0 %v3502_v52, %s3161_s28 }
 0x464   :  { %v575_v57 = vpop.permute.xlu1 %574 }
 0x465   :  { %v592_v58 = vadd.f32 %v3481_v34, %v575_v57 }
 0x467   :  { %3051 = vrcp.f32 %v592_v58 }
 0x468   :  { %v577_v60 = vpop.permute.xlu0 %576 }
 0x469   :  { %v593_v61 = vadd.f32 %v3486_v45, %v577_v60 }
 0x46b   :  { %3053 = vrcp.f32 %v593_v61 }
 0x46c   :  { %v579_v63 = vpop.permute.xlu1 %578 }
 0x46d   :  { %v594_v0 = vadd.f32 %v3490_v48, %v579_v63 }
 0x46f   :  { %3055 = vrcp.f32 %v594_v0 }
 0x470   :  { %v581_v2 = vpop.permute.xlu0 %580 }
 0x471   :  { %v595_v3 = vadd.f32 %v3494_v49, %v581_v2 }
 0x473   :  { %3057 = vrcp.f32 %v595_v3 }
 0x474   :  { %v3052_v4 = vpop.eup %3051  ;;  %v583_v5 = vpop.permute.xlu1 %582 }
 0x475   :  { %v596_v6 = vadd.f32 %v3498_v51, %v583_v5  ;;  %610 = vrot.lane.b32.xlu1 %v3052_v4, %s3162_s4 }
 0x477   :  { %3059 = vrcp.f32 %v596_v6 }
 0x478   :  { %v3054_v7 = vpop.eup %3053  ;;  %v585_v8 = vpop.permute.xlu0 %584 }
 0x479   :  { %v597_v9 = vadd.f32 %v3502_v52, %v585_v8  ;;  %612 = vrot.lane.b32.xlu0 %v3054_v7, %s3162_s4 }
 0x47b   :  { %3061 = vrcp.f32 %v597_v9 }
 0x47c   :  { %v3056_v10 = vpop.eup %3055 }
 0x47d   :  { %614 = vrot.lane.b32.xlu1 %v3056_v10, %s3162_s4 }
 0x480   :  { %v3058_v11 = vpop.eup %3057 }
 0x481   :  { %616 = vrot.lane.b32.xlu0 %v3058_v11, %s3162_s4 }
 0x484   :  { %v3060_v12 = vpop.eup %3059 }
 0x485   :  { %618 = vrot.lane.b32.xlu1 %v3060_v12, %s3162_s4 }
 0x488   :  { %v3062_v14 = vpop.eup %3061 }
 0x489   :  { %335 = vrot.lane.b32.xlu1 %v3407_v47, %s3163_s22  ;;  %620 = vrot.lane.b32.xlu0 %v3062_v14, %s3162_s4 }
 0x48d   :  { %347 = vrot.lane.b32.xlu1 %v3425_v56, %s3160_s27  ;;  %337 = vrot.lane.b32.xlu0 %v3413_v50, %s3163_s22 }
 0x491   :  { %339 = vrot.lane.b32.xlu1 %v3419_v53, %s3163_s22  ;;  %349 = vrot.lane.b32.xlu0 %v3429_v59, %s3160_s27 }
 0x495   :  { %351 = vrot.lane.b32.xlu0 %v3433_v62, %s3160_s27 }
 0x4e7   :  { %v611_v47 = vpop.permute.xlu1 %610 }
 0x4e8   :  { %v628_v16 = vsel %vm543_vm3, %v3052_v4, %v611_v47 }
 0x4e9   :  { %v634_v50 = vmul.f32 %v3481_v34, %v628_v16  ;;  %v2493_v16 = vld [vmem:[%s4168_s9] ss:$0 sm:$0xff] }
 0x4eb   :  { %v613_v17 = vpop.permute.xlu0 %612 }
 0x4ec   :  { %v629_v56 = vsel %vm543_vm3, %v3054_v7, %v613_v17 }
 0x4ed   :  { %v635_v18 = vmul.f32 %v3486_v45, %v629_v56 }
 0x4ef   :  { %v640_v21 = vpack.c.bf16 %v635_v18, %v634_v50  ;;  %v615_v22 = vpop.permute.xlu1 %614 }
 0x4f0   :  { %v630_v53 = vsel %vm543_vm3, %v3056_v10, %v615_v22 }
 0x4f1   :  { %2770 = vmatmul.mubr.msk.bf16.vlgmr.msra.gmra.mxu0 %vm643_vm5, %v640_v21  ;;  %v636_v23 = vmul.f32 %v3490_v48, %v630_v53 }
 0x4f2   :  { %2773 = vmatprep.mubr.msk.bf16.mxu0 %vm3158_vm0, %v3157_v1 }
 0x4f3   :  { %v617_v59 = vpop.permute.xlu0 %616 }
 0x4f4   :  { %v631_v62 = vsel %vm543_vm3, %v3058_v11, %v617_v59 }
 0x4f5   :  { %v637_v24 = vmul.f32 %v3494_v49, %v631_v62 }
 0x4f7   :  { %v641_v25 = vpack.c.bf16 %v637_v24, %v636_v23  ;;  %v619_v26 = vpop.permute.xlu1 %618 }
 0x4f8   :  { %v632_v27 = vsel %vm543_vm3, %v3060_v12, %v619_v26 }
 0x4f9   :  { %2774 = vmatmul.mubr.msk.bf16.gmra.mxu0 %vm643_vm5, %v641_v25  ;;  %v638_v32 = vmul.f32 %v3498_v51, %v632_v27 }
 0x4fa   :  { %2777 = vmatprep.mubr.msk.bf16.mxu0 %vm3158_vm0, %v3157_v1 }
 0x4fb   :  { %v621_v30 = vpop.permute.xlu0 %620  ;;  %v336_v39 = vpop.permute.xlu1 %335 }
 0x4fc   :  { %v633_v31 = vsel %vm543_vm3, %v3062_v14, %v621_v30 }
 0x4fd   :  { %v639_v33 = vmul.f32 %v3502_v52, %v633_v31 }
 0x4ff   :  { %v642_v34 = vpack.c.bf16 %v639_v33, %v638_v32  ;;  %v338_v40 = vpop.permute.xlu0 %337  ;;  %v348_v46 = vpop.permute.xlu1 %347 }
 0x500   :  { %v356_v51 = vsel %vm253_vm1, %v336_v39, %v348_v46 }
 0x501   :  { %2778 = vmatmul.mubr.msk.bf16.gmra.mxu0 %vm643_vm5, %v642_v34 }
 0x502   :  { %2805 = vmatprep.mubr.msk.bf16.mxu0 %vm3158_vm0, %v3157_v1 }
 0x503   :  { %v350_v48 = vpop.permute.xlu0 %349  ;;  %v340_v3 = vpop.permute.xlu1 %339 }
 0x504   :  { %v357_v52 = vsel %vm253_vm1, %v338_v40, %v350_v48 }
 0x507   :  { %v352_v0 = vpop.permute.xlu0 %351 }
 0x508   :  { %v358_v4 = vsel %vm253_vm1, %v340_v3, %v352_v0 }
 0x5b1   :  { %v691_v45 = vpop.f32.mrf.mxu0 }
 0x5b2   :  { %v714_v57 = vmul.f32 %v691_v45, %v356_v51 }
 0x5b3   :  { %v2771_v49 = vpop.f32.mrf.mxu0 }
 0x5b5   :  { %v694_v54 = vpop.f32.mrf.mxu0 }
 0x5b6   :  { %v715_v58 = vmul.f32 %v694_v54, %v357_v52 }
 0x5b7   :  { %v2772_v60 = vpop.f32.mrf.mxu0 }
 0x5b8   :  { %v729_v61 = vpack.c.bf16 %v715_v58, %v714_v57 }
 0x5b9   :  { %v699_v63 = vpop.f32.mrf.mxu0 }
 0x5ba   :  { %2790 = vmatmul.mubr.msk.bf16.vlgmr.msra.gmra.mxu1 %vm416_vm2, %v729_v61  ;;  %v716_v6 = vmul.f32 %v699_v63, %v358_v4 }
 0x5bb   :  { %v2775_v2 = vpop.f32.mrf.mxu0  ;;  %2793 = vmatprep.mubr.msk.bf16.mxu1 %vm3158_vm0, %v3157_v1 }
 0x5bd   :  { %v702_v5 = vpop.f32.mrf.mxu0 }
 0x5be   :  { %v717_v7 = vmul.f32 %v702_v5, %v356_v51 }
 0x5bf   :  { %v2776_v8 = vpop.f32.mrf.mxu0 }
 0x5c0   :  { %v730_v9 = vpack.c.bf16 %v717_v7, %v716_v6 }
 0x5c1   :  { %v707_v10 = vpop.f32.mrf.mxu0 }
 0x5c2   :  { %2794 = vmatmul.mubr.msk.bf16.gmra.mxu1 %vm416_vm2, %v730_v9  ;;  %v718_v13 = vmul.f32 %v707_v10, %v357_v52 }
 0x5c3   :  { %v2779_v11 = vpop.f32.mrf.mxu0  ;;  %2797 = vmatprep.mubr.msk.bf16.mxu1 %vm3158_vm0, %v3157_v1 }
 0x5c5   :  { %v710_v12 = vpop.f32.mrf.mxu0 }
 0x5c6   :  { %v719_v14 = vmul.f32 %v710_v12, %v358_v4 }
 0x5c7   :  { %v2780_v15 = vpop.f32.mrf.mxu0 }
 0x5c8   :  { %v731_v47 = vpack.c.bf16 %v719_v14, %v718_v13 }
 0x5ca   :  { %2798 = vmatmul.mubr.msk.bf16.gmra.mxu1 %vm416_vm2, %v731_v47 }
 0x5cb   :  { %2833 = vmatprep.mubr.msk.bf16.mxu1 %vm3158_vm0, %v3157_v1 }
 0x67a   :  { %v805_v17 = vpop.f32.mrf.mxu1 }
 0x67b   :  { %v806_v56 = vadd.f32 %v2493_v16, %v805_v17 }
 0x67c   :  { %v2791_v50 = vpop.f32.mrf.mxu1 }
 0x67d   :  { %v828_v18 = vadd.f32 %v806_v56, %v3337_v19  ;;  %v3011_v50 = vld [vmem:[%s4169_s10 + $0x8] sm:$0xff]  }
 0x67e   :  { %v808_v21 = vpop.f32.mrf.mxu1  ;;  %2802 = vmatpush3.bf16.msra.mxu0 %v3011_v50 }
 0x67f   :  { %v809_v22 = vadd.f32 %v2493_v16, %v808_v21  ;;  %v836_v53 = vsel %vm253_vm1, %v828_v18, 0.0  ;;  %2803 = vmatprep.subr.bf16.mxu0 %v3157_v1  ;;  %v3013_v21 = vld [vmem:[%s4171_s12 + $0x38] sm:$0xff]  }
 0x680   :  { %837 = vadd.xlane.f32.xlu1 %v836_v53  ;;  %v2792_v59 = vpop.f32.mrf.mxu1  ;;  %2818 = vmatpush3.bf16.msra.mxu1 %v3013_v21  ;;  %v3015_v53 = vld [vmem:[%s4171_s12 + $0x28] sm:$0xff]  }
 0x681   :  { %v829_v62 = vadd.f32 %v809_v22, %v3339_v20  ;;  %v3014_v22 = vld [vmem:[%s4171_s12 + $0x30] sm:$0xff]   ;;  %2819 = vmatprep.subr.bf16.mxu1 %v3157_v1  ;;  %v3016_v59 = vld [vmem:[%s4171_s12 + $0x20] sm:$0xff]  }
 0x682   :  { %v813_v23 = vpop.f32.mrf.mxu1 }
 0x683   :  { %v814_v24 = vadd.f32 %v2493_v16, %v813_v23  ;;  %v839_v25 = vsel %vm253_vm1, %v829_v62, 0.0 }
 0x684   :  { %840 = vadd.xlane.f32.xlu0 %v839_v25  ;;  %v2795_v26 = vpop.f32.mrf.mxu1  ;;  %2820 = vmatpush3.bf16.msra.mxu1 %v3014_v22 }
 0x685   :  { %v830_v27 = vadd.f32 %v814_v24, %v3352_v28  ;;  %2821 = vmatprep.subr.bf16.mxu1 %v3157_v1 }
 0x686   :  { %v816_v30 = vpop.f32.mrf.mxu1 }
 0x687   :  { %v817_v31 = vadd.f32 %v2493_v16, %v816_v30  ;;  %v842_v19 = vsel %vm253_vm1, %v830_v27, 0.0 }
 0x688   :  { %843 = vadd.xlane.f32.xlu0 %v842_v19  ;;  %v2796_v32 = vpop.f32.mrf.mxu1  ;;  %2822 = vmatpush3.bf16.msra.mxu1 %v3015_v53 }
 0x689   :  { %v831_v33 = vadd.f32 %v817_v31, %v3354_v29  ;;  %2823 = vmatprep.subr.bf16.mxu1 %v3157_v1 }
 0x68a   :  { %v821_v34 = vpop.f32.mrf.mxu1 }
 0x68b   :  { %v822_v35 = vadd.f32 %v2493_v16, %v821_v34  ;;  %v845_v20 = vsel %vm253_vm1, %v831_v33, 0.0 }
 0x68c   :  { %846 = vadd.xlane.f32.xlu1 %v845_v20  ;;  %v2799_v36 = vpop.f32.mrf.mxu1  ;;  %2824 = vmatpush3.bf16.msra.mxu1 %v3016_v59 }
 0x68d   :  { %v832_v39 = vadd.f32 %v822_v35, %v3367_v37  ;;  %2825 = vmatprep.subr.bf16.mxu1 %v3157_v1 }
 0x68e   :  { %v824_v40 = vpop.f32.mrf.mxu1 }
 0x68f   :  { %v825_v45 = vadd.f32 %v2493_v16, %v824_v40  ;;  %v848_v28 = vsel %vm253_vm1, %v832_v39, 0.0 }
 0x690   :  { %849 = vadd.xlane.f32.xlu0 %v848_v28  ;;  %v2800_v46 = vpop.f32.mrf.mxu1  ;;  %v2501_v28 = vld [vmem:[%s4173_s14] ss:$0 sm:$0xff] }
 0x691   :  { %v833_v48 = vadd.f32 %v825_v45, %v3369_v38 }
 0x693   :  { %v851_v49 = vsel %vm253_vm1, %v833_v48, 0.0 }
 0x694   :  { %852 = vadd.xlane.f32.xlu1 %v851_v49 }
 0x709   :  { %v838_v29 = vpop.xlane.xlu1 %837 }
 0x70a   :  { %v855_v51 = vmul.f32 0.03125, %v838_v29 }
 0x70c   :  { %v3601_v52 = vsub.f32 %v828_v18, %v855_v51  ;;  %v3012_v18 = vld [vmem:[%s4169_s10] sm:$0xff]  }
 0x70d   :  { %v841_v54 = vpop.xlane.xlu0 %840  ;;  %2804 = vmatpush3.bf16.msra.mxu0 %v3012_v18 }
 0x70e   :  { %v856_v57 = vmul.f32 0.03125, %v841_v54  ;;  %v867_v37 = vmul.f32 %v3601_v52, %v3601_v52  ;;  %2845 = vmatprep.subr.bf16.mxu0 %v3157_v1 }
 0x710   :  { %v3605_v58 = vsub.f32 %v829_v62, %v856_v57  ;;  %v873_v60 = vsel %vm253_vm1, %v867_v37, 0.0  ;;  %v3017_v62 = vld [vmem:[%s4171_s12 + $0x18] sm:$0xff]   ;;  %v2502_v57 = vld [vmem:[%s4174_s15] ss:$0 sm:$0xff] }
 0x711   :  { %v844_v61 = vpop.xlane.xlu0 %843  ;;  %874 = vadd.xlane.f32.xlu0 %v873_v60  ;;  %2826 = vmatpush3.bf16.msra.mxu1 %v3017_v62 }
 0x712   :  { %v857_v63 = vmul.f32 0.03125, %v844_v61  ;;  %v868_v38 = vmul.f32 %v3605_v58, %v3605_v58  ;;  %2827 = vmatprep.subr.bf16.mxu1 %v3157_v1 }
 0x714   :  { %v3610_v0 = vsub.f32 %v830_v27, %v857_v63  ;;  %v876_v2 = vsel %vm253_vm1, %v868_v38, 0.0 }
 0x715   :  { %v847_v3 = vpop.xlane.xlu1 %846  ;;  %877 = vadd.xlane.f32.xlu1 %v876_v2 }
 0x716   :  { %v858_v4 = vmul.f32 0.03125, %v847_v3  ;;  %v869_v5 = vmul.f32 %v3610_v0, %v3610_v0 }
 0x718   :  { %v3615_v6 = vsub.f32 %v831_v33, %v858_v4  ;;  %v879_v7 = vsel %vm253_vm1, %v869_v5, 0.0 }
 0x719   :  { %880 = vadd.xlane.f32.xlu0 %v879_v7  ;;  %v850_v8 = vpop.xlane.xlu0 %849 }
 0x71a   :  { %v859_v9 = vmul.f32 0.03125, %v850_v8  ;;  %v870_v10 = vmul.f32 %v3615_v6, %v3615_v6 }
 0x71c   :  { %v3620_v11 = vsub.f32 %v832_v39, %v859_v9  ;;  %v882_v12 = vsel %vm253_vm1, %v870_v10, 0.0 }
 0x71d   :  { %883 = vadd.xlane.f32.xlu1 %v882_v12  ;;  %v853_v13 = vpop.xlane.xlu1 %852 }
 0x71e   :  { %v860_v14 = vmul.f32 0.03125, %v853_v13  ;;  %v871_v15 = vmul.f32 %v3620_v11, %v3620_v11 }
 0x720   :  { %v3625_v47 = vsub.f32 %v833_v48, %v860_v14  ;;  %v885_v16 = vsel %vm253_vm1, %v871_v15, 0.0 }
 0x721   :  { %886 = vadd.xlane.f32.xlu0 %v885_v16  ;;  %v3019_v16 = vld [vmem:[%s4171_s12 + $0x8] sm:$0xff]  }
 0x722   :  { %v872_v17 = vmul.f32 %v3625_v47, %v3625_v47 }
 0x724   :  { %v888_v56 = vsel %vm253_vm1, %v872_v17, 0.0  ;;  %v3020_v17 = vld [vmem:[%s4171_s12] sm:$0xff]  }
 0x725   :  { %889 = vadd.xlane.f32.xlu1 %v888_v56  ;;  %v2503_v56 = vld [vmem:[%s4170_s11] ss:$0 sm:$0xff] }
 0x79a   :  { %v875_v23 = vpop.xlane.xlu0 %874 }
 0x79b   :  { %v891_v24 = vmul.f32 0.03125, %v875_v23 }
 0x79d   :  { %v897_v25 = vadd.f32 1e-05, %v891_v24 }
 0x79e   :  { %v878_v26 = vpop.xlane.xlu1 %877 }
 0x79f   :  { %3063 = vrsqrt.f32 %v897_v25  ;;  %v892_v27 = vmul.f32 0.03125, %v878_v26 }
 0x7a1   :  { %v898_v30 = vadd.f32 1e-05, %v892_v27 }
 0x7a2   :  { %v881_v31 = vpop.xlane.xlu0 %880 }
 0x7a3   :  { %3065 = vrsqrt.f32 %v898_v30  ;;  %v893_v19 = vmul.f32 0.03125, %v881_v31 }
 0x7a5   :  { %v899_v32 = vadd.f32 1e-05, %v893_v19 }
 0x7a6   :  { %v884_v33 = vpop.xlane.xlu1 %883 }
 0x7a7   :  { %3067 = vrsqrt.f32 %v899_v32  ;;  %v894_v34 = vmul.f32 0.03125, %v884_v33 }
 0x7a9   :  { %v900_v35 = vadd.f32 1e-05, %v894_v34 }
 0x7aa   :  { %v887_v20 = vpop.xlane.xlu0 %886 }
 0x7ab   :  { %3069 = vrsqrt.f32 %v900_v35  ;;  %v895_v36 = vmul.f32 0.03125, %v887_v20 }
 0x7ac   :  { %v3064_v39 = vpop.eup %3063 }
 0x7ad   :  { %v909_v40 = vmul.f32 %v3064_v39, %v3601_v52  ;;  %v901_v45 = vadd.f32 1e-05, %v895_v36 }
 0x7ae   :  { %v890_v46 = vpop.xlane.xlu1 %889 }
 0x7af   :  { %3071 = vrsqrt.f32 %v901_v45  ;;  %v896_v48 = vmul.f32 0.03125, %v890_v46  ;;  %v921_v29 = vmul.f32 %v2501_v28, %v909_v40  ;;  %v2509_v46 = vld [vmem:[%s4172_s13] ss:$0 sm:$0xff] }
 0x7b0   :  { %v3066_v49 = vpop.eup %3065 }
 0x7b1   :  { %v910_v51 = vmul.f32 %v3066_v49, %v3605_v58  ;;  %v902_v54 = vadd.f32 1e-05, %v896_v48  ;;  %v3667_v60 = vadd.f32 %v2502_v57, %v921_v29 }
 0x7b3   :  { %v922_v37 = vmul.f32 %v2501_v28, %v910_v51  ;;  %3073 = vrsqrt.f32 %v902_v54 }
 0x7b4   :  { %v3068_v52 = vpop.eup %3067 }
 0x7b5   :  { %v3669_v61 = vadd.f32 %v2502_v57, %v922_v37  ;;  %v911_v63 = vmul.f32 %v3068_v52, %v3610_v0 }
 0x7b7   :  { %v944_v38 = vpack.c.bf16 %v3669_v61, %v3667_v60  ;;  %v923_v3 = vmul.f32 %v2501_v28, %v911_v63 }
 0x7b8   :  { %v3070_v2 = vpop.eup %3069 }
 0x7b9   :  { %2806 = vmatmul.mubr.msk.bf16.vlgmr.msra.gmra.mxu0 %vm253_vm1, %v944_v38  ;;  %v912_v58 = vmul.f32 %v3070_v2, %v3615_v6  ;;  %v3678_v7 = vadd.f32 %v2502_v57, %v923_v3 }
 0x7ba   :  { %2809 = vmatprep.mubr.msk.bf16.mxu0 %vm3158_vm0, %v3157_v1 }
 0x7bb   :  { %v924_v4 = vmul.f32 %v2501_v28, %v912_v58 }
 0x7bc   :  { %v3072_v5 = vpop.eup %3071 }
 0x7bd   :  { %v3680_v8 = vadd.f32 %v2502_v57, %v924_v4  ;;  %v913_v0 = vmul.f32 %v3072_v5, %v3620_v11 }
 0x7bf   :  { %v945_v9 = vpack.c.bf16 %v3680_v8, %v3678_v7  ;;  %v925_v12 = vmul.f32 %v2501_v28, %v913_v0 }
 0x7c0   :  { %v3074_v10 = vpop.eup %3073 }
 0x7c1   :  { %2810 = vmatmul.mubr.msk.bf16.gmra.mxu0 %vm253_vm1, %v945_v9  ;;  %v914_v6 = vmul.f32 %v3074_v10, %v3625_v47  ;;  %v3689_v14 = vadd.f32 %v2502_v57, %v925_v12  ;;  %v3018_v47 = vld [vmem:[%s4171_s12 + $0x10] sm:$0xff]  }
 0x7c2   :  { %2813 = vmatprep.mubr.msk.bf16.mxu0 %vm3158_vm0, %v3157_v1  ;;  %2828 = vmatpush3.bf16.msra.mxu1 %v3018_v47 }
 0x7c3   :  { %v926_v13 = vmul.f32 %v2501_v28, %v914_v6  ;;  %2829 = vmatprep.subr.bf16.mxu1 %v3157_v1 }
 0x7c5   :  { %v3691_v15 = vadd.f32 %v2502_v57, %v926_v13 }
 0x7c6   :  { %2830 = vmatpush3.bf16.msra.mxu1 %v3019_v16 }
 0x7c7   :  { %v946_v11 = vpack.c.bf16 %v3691_v15, %v3689_v14  ;;  %2831 = vmatprep.subr.bf16.mxu1 %v3157_v1 }
 0x7c9   :  { %2814 = vmatmul.mubr.msk.bf16.gmra.mxu0 %vm253_vm1, %v946_v11 }
 0x7ca   :  { %2849 = vmatprep.mubr.msk.bf16.mxu0 %vm3158_vm0, %v3157_v1  ;;  %2832 = vmatpush3.bf16.msra.mxu1 %v3020_v17 }
 0x7cb   :  { %2861 = vmatprep.subr.bf16.mxu1 %v3157_v1 }
 0x879   :  { %v1008_v50 = vpop.f32.mrf.mxu0 }
 0x87a   :  { %v1009_v21 = vadd.f32 %v2503_v56, %v1008_v50 }
 0x87b   :  { %v2807_v18 = vpop.f32.mrf.mxu0 }
 0x87c   :  { %v1031_v62 = vmax.f32 %v1009_v21, 0.0 }
 0x87d   :  { %v1011_v22 = vpop.f32.mrf.mxu0 }
 0x87e   :  { %v1012_v53 = vadd.f32 %v2503_v56, %v1011_v22 }
 0x87f   :  { %v2808_v59 = vpop.f32.mrf.mxu0 }
 0x880   :  { %v1032_v23 = vmax.f32 %v1012_v53, 0.0 }
 0x881   :  { %v1016_v24 = vpop.f32.mrf.mxu0 }
 0x882   :  { %v1054_v25 = vpack.c.bf16 %v1032_v23, %v1031_v62  ;;  %v1017_v27 = vadd.f32 %v2503_v56, %v1016_v24 }
 0x883   :  { %v2811_v26 = vpop.f32.mrf.mxu0 }
 0x884   :  { %2834 = vmatmul.mubr.bf16.vlgmr.msra.gmra.mxu1 %v1054_v25  ;;  %v1033_v32 = vmax.f32 %v1017_v27, 0.0 }
 0x885   :  { %v1019_v30 = vpop.f32.mrf.mxu0  ;;  %2837 = vmatprep.mubr.msk.bf16.mxu1 %vm3158_vm0, %v3157_v1  ;;  %2862 = vmatpush3.bf16.msra.mxu1 %v3379_v41 }
 0x886   :  { %v1020_v31 = vadd.f32 %v2503_v56, %v1019_v30  ;;  %2863 = vmatprep.subr.bf16.mxu1 %v3157_v1 }
 0x887   :  { %v2812_v19 = vpop.f32.mrf.mxu0 }
 0x888   :  { %v1034_v33 = vmax.f32 %v1020_v31, 0.0 }
 0x889   :  { %v1024_v34 = vpop.f32.mrf.mxu0  ;;  %2864 = vmatpush3.bf16.msra.mxu1 %v3385_v42 }
 0x88a   :  { %v1055_v35 = vpack.c.bf16 %v1034_v33, %v1033_v32  ;;  %2865 = vmatprep.subr.bf16.mxu1 %v3157_v1  ;;  %v1025_v36 = vadd.f32 %v2503_v56, %v1024_v34 }
 0x88b   :  { %v2815_v20 = vpop.f32.mrf.mxu0 }
 0x88c   :  { %2838 = vmatmul.mubr.bf16.gmra.mxu1 %v1055_v35  ;;  %v1035_v45 = vmax.f32 %v1025_v36, 0.0 }
 0x88d   :  { %v1027_v39 = vpop.f32.mrf.mxu0  ;;  %2841 = vmatprep.mubr.msk.bf16.mxu1 %vm3158_vm0, %v3157_v1  ;;  %2866 = vmatpush3.bf16.msra.mxu1 %v3393_v43 }
 0x88e   :  { %v1028_v41 = vadd.f32 %v2503_v56, %v1027_v39  ;;  %2867 = vmatprep.subr.bf16.mxu1 %v3157_v1 }
 0x88f   :  { %v2816_v40 = vpop.f32.mrf.mxu0 }
 0x890   :  { %v1036_v28 = vmax.f32 %v1028_v41, 0.0 }
 0x891   :  { %2868 = vmatpush3.bf16.msra.mxu1 %v3400_v44 }
 0x892   :  { %v1056_v42 = vpack.c.bf16 %v1036_v28, %v1035_v45  ;;  %2895 = vmatprep.subr.bf16.mxu1 %v3157_v1 }
 0x894   :  { %2842 = vmatmul.mubr.bf16.gmra.mxu1 %v1056_v42  ;;  %v3021_v42 = vld [vmem:[%s4165_s6 + $0x18] sm:$0xff]  }
 0x895   :  { %2869 = vmatprep.mubr.msk.bf16.mxu1 %vm3158_vm0, %v3157_v1  ;;  %2846 = vmatpush3.bf16.msra.mxu0 %v3021_v42 }
 0x896   :  { %2847 = vmatprep.subr.bf16.mxu0 %v3157_v1 }
 0x944   :  { %v1145_v43 = vpop.f32.mrf.mxu1 }
 0x945   :  { %v1146_v48 = vadd.f32 %v2509_v46, %v1145_v43 }
 0x946   :  { %v2835_v49 = vpop.f32.mrf.mxu1 }
 0x947   :  { %v1168_v29 = vadd.f32 %v1146_v48, %v3667_v60 }
 0x948   :  { %v1148_v51 = vpop.f32.mrf.mxu1 }
 0x949   :  { %v1149_v54 = vadd.f32 %v2509_v46, %v1148_v51  ;;  %v1176_v44 = vsel %vm253_vm1, %v1168_v29, 0.0 }
 0x94a   :  { %1177 = vadd.xlane.f32.xlu0 %v1176_v44  ;;  %v2836_v57 = vpop.f32.mrf.mxu1 }
 0x94b   :  { %v1169_v37 = vadd.f32 %v1149_v54, %v3669_v61 }
 0x94c   :  { %v1153_v52 = vpop.f32.mrf.mxu1 }
 0x94d   :  { %v1154_v63 = vadd.f32 %v2509_v46, %v1153_v52  ;;  %v1179_v38 = vsel %vm253_vm1, %v1169_v37, 0.0 }
 0x94e   :  { %1180 = vadd.xlane.f32.xlu1 %v1179_v38  ;;  %v2839_v2 = vpop.f32.mrf.mxu1 }
 0x94f   :  { %v1170_v58 = vadd.f32 %v1154_v63, %v3678_v7 }
 0x950   :  { %v1156_v3 = vpop.f32.mrf.mxu1 }
 0x951   :  { %v1157_v4 = vadd.f32 %v2509_v46, %v1156_v3  ;;  %v1182_v60 = vsel %vm253_vm1, %v1170_v58, 0.0 }
 0x952   :  { %1183 = vadd.xlane.f32.xlu0 %v1182_v60  ;;  %v2840_v5 = vpop.f32.mrf.mxu1 }
 0x953   :  { %v1171_v0 = vadd.f32 %v1157_v4, %v3680_v8  ;;  %v2518_v5 = vld [vmem:[%s4175_s16] ss:$0 sm:$0xff] }
 0x954   :  { %v1161_v9 = vpop.f32.mrf.mxu1 }
 0x955   :  { %v1162_v10 = vadd.f32 %v2509_v46, %v1161_v9  ;;  %v1185_v61 = vsel %vm253_vm1, %v1171_v0, 0.0 }
 0x956   :  { %1186 = vadd.xlane.f32.xlu1 %v1185_v61  ;;  %v2843_v6 = vpop.f32.mrf.mxu1 }
 0x957   :  { %v1172_v12 = vadd.f32 %v1162_v10, %v3689_v14 }
 0x958   :  { %v1164_v13 = vpop.f32.mrf.mxu1 }
 0x959   :  { %v1165_v11 = vadd.f32 %v2509_v46, %v1164_v13  ;;  %v1188_v7 = vsel %vm253_vm1, %v1172_v12, 0.0  ;;  %v3022_v46 = vld [vmem:[%s4165_s6 + $0x10] sm:$0xff]   ;;  %v2519_v13 = vld [vmem:[%s4176_s17] ss:$0 sm:$0xff] }
 0x95a   :  { %1189 = vadd.xlane.f32.xlu0 %v1188_v7  ;;  %v2844_v47 = vpop.f32.mrf.mxu1  ;;  %2848 = vmatpush3.bf16.msra.mxu0 %v3022_v46 }
 0x95b   :  { %v1173_v16 = vadd.f32 %v1165_v11, %v3691_v15  ;;  %2881 = vmatprep.subr.bf16.mxu0 %v3157_v1 }
 0x95d   :  { %v1191_v17 = vsel %vm253_vm1, %v1173_v16, 0.0 }
 0x95e   :  { %1192 = vadd.xlane.f32.xlu1 %v1191_v17 }
 0x9d3   :  { %v1178_v8 = vpop.xlane.xlu0 %1177 }
 0x9d4   :  { %v1194_v56 = vmul.f32 0.03125, %v1178_v8 }
 0x9d6   :  { %v1200_v50 = vsub.f32 %v1168_v29, %v1194_v56 }
 0x9d7   :  { %v1181_v18 = vpop.xlane.xlu1 %1180 }
 0x9d8   :  { %v1195_v21 = vmul.f32 0.03125, %v1181_v18  ;;  %v1206_v22 = vmul.f32 %v1200_v50, %v1200_v50 }
 0x9da   :  { %v3742_v53 = vsub.f32 %v1169_v37, %v1195_v21  ;;  %v1212_v14 = vsel %vm253_vm1, %v1206_v22, 0.0 }
 0x9db   :  { %v1184_v59 = vpop.xlane.xlu0 %1183  ;;  %1213 = vadd.xlane.f32.xlu0 %v1212_v14 }
 0x9dc   :  { %v1196_v62 = vmul.f32 0.03125, %v1184_v59  ;;  %v1207_v23 = vmul.f32 %v3742_v53, %v3742_v53 }
 0x9de   :  { %v3747_v15 = vsub.f32 %v1170_v58, %v1196_v62  ;;  %v1215_v24 = vsel %vm253_vm1, %v1207_v23, 0.0 }
 0x9df   :  { %v1187_v25 = vpop.xlane.xlu1 %1186  ;;  %1216 = vadd.xlane.f32.xlu1 %v1215_v24 }
 0x9e0   :  { %v1197_v26 = vmul.f32 0.03125, %v1187_v25  ;;  %v1208_v27 = vmul.f32 %v3747_v15, %v3747_v15 }
 0x9e2   :  { %v3752_v30 = vsub.f32 %v1171_v0, %v1197_v26  ;;  %v1218_v31 = vsel %vm253_vm1, %v1208_v27, 0.0 }
 0x9e3   :  { %1219 = vadd.xlane.f32.xlu0 %v1218_v31  ;;  %v1190_v19 = vpop.xlane.xlu0 %1189 }
 0x9e4   :  { %v1198_v32 = vmul.f32 0.03125, %v1190_v19  ;;  %v1209_v33 = vmul.f32 %v3752_v30, %v3752_v30 }
 0x9e6   :  { %v3757_v34 = vsub.f32 %v1172_v12, %v1198_v32  ;;  %v1221_v35 = vsel %vm253_vm1, %v1209_v33, 0.0 }
 0x9e7   :  { %1222 = vadd.xlane.f32.xlu1 %v1221_v35  ;;  %v1193_v20 = vpop.xlane.xlu1 %1192 }
 0x9e8   :  { %v1199_v36 = vmul.f32 0.03125, %v1193_v20  ;;  %v1210_v39 = vmul.f32 %v3757_v34, %v3757_v34 }
 0x9ea   :  { %v3762_v41 = vsub.f32 %v1173_v16, %v1199_v36  ;;  %v1224_v40 = vsel %vm253_vm1, %v1210_v39, 0.0 }
 0x9eb   :  { %1225 = vadd.xlane.f32.xlu0 %v1224_v40 }
 0x9ec   :  { %v1211_v45 = vmul.f32 %v3762_v41, %v3762_v41 }
 0x9ee   :  { %v1227_v28 = vsel %vm253_vm1, %v1211_v45, 0.0 }
 0x9ef   :  { %1228 = vadd.xlane.f32.xlu1 %v1227_v28 }
 0xa64   :  { %v1214_v43 = vpop.xlane.xlu0 %1213 }
 0xa65   :  { %v1230_v48 = vmul.f32 0.03125, %v1214_v43 }
 0xa67   :  { %v1236_v49 = vadd.f32 1e-05, %v1230_v48 }
 0xa68   :  { %v1217_v29 = vpop.xlane.xlu1 %1216 }
 0xa69   :  { %3075 = vrsqrt.f32 %v1236_v49  ;;  %v1231_v51 = vmul.f32 0.03125, %v1217_v29 }
 0xa6b   :  { %v1237_v54 = vadd.f32 1e-05, %v1231_v51 }
 0xa6c   :  { %v1220_v44 = vpop.xlane.xlu0 %1219 }
 0xa6d   :  { %3077 = vrsqrt.f32 %v1237_v54  ;;  %v1232_v57 = vmul.f32 0.03125, %v1220_v44 }
 0xa6f   :  { %v1238_v37 = vadd.f32 1e-05, %v1232_v57 }
 0xa70   :  { %v1223_v52 = vpop.xlane.xlu1 %1222 }
 0xa71   :  { %3079 = vrsqrt.f32 %v1238_v37  ;;  %v1233_v63 = vmul.f32 0.03125, %v1223_v52 }
 0xa73   :  { %v1239_v38 = vadd.f32 1e-05, %v1233_v63 }
 0xa74   :  { %v1226_v2 = vpop.xlane.xlu0 %1225 }
 0xa75   :  { %3081 = vrsqrt.f32 %v1239_v38  ;;  %v1234_v58 = vmul.f32 0.03125, %v1226_v2 }
 0xa76   :  { %v3076_v3 = vpop.eup %3075 }
 0xa77   :  { %v1248_v4 = vmul.f32 %v3076_v3, %v1200_v50  ;;  %v1240_v60 = vadd.f32 1e-05, %v1234_v58 }
 0xa78   :  { %v1229_v0 = vpop.xlane.xlu1 %1228 }
 0xa79   :  { %3083 = vrsqrt.f32 %v1240_v60  ;;  %v1235_v9 = vmul.f32 0.03125, %v1229_v0  ;;  %v1260_v61 = vmul.f32 %v2518_v5, %v1248_v4 }
 0xa7a   :  { %v3078_v10 = vpop.eup %3077 }
 0xa7b   :  { %v1249_v6 = vmul.f32 %v3078_v10, %v3742_v53  ;;  %v1241_v12 = vadd.f32 1e-05, %v1235_v9  ;;  %v3783_v47 = vadd.f32 %v2519_v13, %v1260_v61 }
 0xa7d   :  { %v1261_v11 = vmul.f32 %v2518_v5, %v1249_v6  ;;  %3085 = vrsqrt.f32 %v1241_v12 }
 0xa7e   :  { %v3080_v7 = vpop.eup %3079 }
 0xa7f   :  { %v3785_v16 = vadd.f32 %v2519_v13, %v1261_v11  ;;  %v1250_v17 = vmul.f32 %v3080_v7, %v3747_v15 }
 0xa81   :  { %v1285_v8 = vpack.c.bf16 %v3785_v16, %v3783_v47  ;;  %v1262_v18 = vmul.f32 %v2518_v5, %v1250_v17 }
 0xa82   :  { %v3082_v56 = vpop.eup %3081 }
 0xa83   :  { %2850 = vmatmul.mubr.msk.bf16.vlgmr.msra.gmra.mxu0 %vm253_vm1, %v1285_v8  ;;  %v1251_v50 = vmul.f32 %v3082_v56, %v3752_v30  ;;  %v3796_v53 = vadd.f32 %v2519_v13, %v1262_v18  ;;  %v2525_v30 = vld [vmem:[%s4166_s7 + $0x1] ss:$0 sm:$0xff] }
 0xa84   :  { %2853 = vmatprep.mubr.msk.bf16.mxu0 %vm3158_vm0, %v3157_v1  ;;  %2882 = vmatpush3.bf16.msra.mxu0 %v3509_v55 }
 0xa85   :  { %v1263_v21 = vmul.f32 %v2518_v5, %v1251_v50  ;;  %2915 = vmatprep.subr.bf16.mxu0 %v3157_v1 }
 0xa86   :  { %v3084_v22 = vpop.eup %3083 }
 0xa87   :  { %v3798_v14 = vadd.f32 %v2519_v13, %v1263_v21  ;;  %v1252_v59 = vmul.f32 %v3084_v22, %v3757_v34 }
 0xa89   :  { %v1286_v62 = vpack.c.bf16 %v3798_v14, %v3796_v53  ;;  %v1264_v24 = vmul.f32 %v2518_v5, %v1252_v59 }
 0xa8a   :  { %v3086_v23 = vpop.eup %3085 }
 0xa8b   :  { %2854 = vmatmul.mubr.msk.bf16.gmra.mxu0 %vm253_vm1, %v1286_v62  ;;  %v1253_v15 = vmul.f32 %v3086_v23, %v3762_v41  ;;  %v3807_v25 = vadd.f32 %v2519_v13, %v1264_v24 }
 0xa8c   :  { %2857 = vmatprep.mubr.msk.bf16.mxu0 %vm3158_vm0, %v3157_v1 }
 0xa8d   :  { %v1265_v55 = vmul.f32 %v2518_v5, %v1253_v15 }
 0xa8f   :  { %v3809_v26 = vadd.f32 %v2519_v13, %v1265_v55 }
 0xa91   :  { %v1287_v27 = vpack.c.bf16 %v3809_v26, %v3807_v25 }
 0xa93   :  { %2858 = vmatmul.mubr.msk.bf16.gmra.mxu0 %vm253_vm1, %v1287_v27 }
 0xa94   :  { %2883 = vmatprep.mubr.msk.bf16.mxu0 %vm3158_vm0, %v3157_v1 }
 0xb43   :  { %v1349_v31 = vpop.f32.mrf.mxu0 }
 0xb44   :  { %v3819_v19 = vadd.f32 %v2525_v30, %v1349_v31 }
 0xb45   :  { %v2851_v32 = vpop.f32.mrf.mxu0 }
 0xb46   :  { %1411 = vrot.lane.b32.xlu1 %v3819_v19, %s3159_s23  ;;  %1375 = vrot.lane.b32.xlu0 %v3819_v19, %s3160_s27 }
 0xb47   :  { %v1352_v33 = vpop.f32.mrf.mxu0 }
 0xb48   :  { %v3825_v34 = vadd.f32 %v2525_v30, %v1352_v33 }
 0xb49   :  { %v2852_v35 = vpop.f32.mrf.mxu0 }
 0xb4a   :  { %1413 = vrot.lane.b32.xlu0 %v3825_v34, %s3159_s23  ;;  %1377 = vrot.lane.b32.xlu1 %v3825_v34, %s3160_s27 }
 0xb4b   :  { %v1357_v20 = vpop.f32.mrf.mxu0 }
 0xb4c   :  { %v3831_v36 = vadd.f32 %v2525_v30, %v1357_v20 }
 0xb4d   :  { %v2855_v39 = vpop.f32.mrf.mxu0 }
 0xb4e   :  { %1415 = vrot.lane.b32.xlu0 %v3831_v36, %s3159_s23  ;;  %1379 = vrot.lane.b32.xlu1 %v3831_v36, %s3160_s27 }
 0xb4f   :  { %v1360_v41 = vpop.f32.mrf.mxu0 }
 0xb50   :  { %v3837_v40 = vadd.f32 %v2525_v30, %v1360_v41 }
 0xb51   :  { %v2856_v45 = vpop.f32.mrf.mxu0 }
 0xb52   :  { %1417 = vrot.lane.b32.xlu1 %v3837_v40, %s3159_s23 }
 0xb53   :  { %v1365_v28 = vpop.f32.mrf.mxu0 }
 0xb54   :  { %v3841_v42 = vadd.f32 %v2525_v30, %v1365_v28 }
 0xb55   :  { %v2859_v46 = vpop.f32.mrf.mxu0 }
 0xb56   :  { %1419 = vrot.lane.b32.xlu0 %v3841_v42, %s3159_s23 }
 0xb57   :  { %v1368_v43 = vpop.f32.mrf.mxu0 }
 0xb58   :  { %v3845_v48 = vadd.f32 %v2525_v30, %v1368_v43 }
 0xb59   :  { %v2860_v49 = vpop.f32.mrf.mxu0 }
 0xb5a   :  { %1421 = vrot.lane.b32.xlu1 %v3845_v48, %s3159_s23 }
 0xbb8   :  { %v1376_v29 = vpop.permute.xlu0 %1375  ;;  %v1412_v51 = vpop.permute.xlu1 %1411 }
 0xbb9   :  { %v1384_v54 = vsel %vm253_vm1, %v1376_v29, %v3837_v40  ;;  %v1429_v44 = vsel %vm253_vm1, %v3819_v19, %v1412_v51 }
 0xbba   :  { %v1435_v38 = vmul.f32 %v1429_v44, %v1384_v54 }
 0xbbc   :  { %v1414_v57 = vpop.permute.xlu0 %1413  ;;  %v1378_v37 = vpop.permute.xlu1 %1377 }
 0xbbd   :  { %v1430_v52 = vsel %vm253_vm1, %v3825_v34, %v1414_v57  ;;  %v1385_v63 = vsel %vm253_vm1, %v1378_v37, %v3841_v42 }
 0xbbe   :  { %v1436_v2 = vmul.f32 %v1430_v52, %v1385_v63 }
 0xbc0   :  { %v1441_v58 = vpack.c.bf16 %v1436_v2, %v1435_v38  ;;  %v1416_v3 = vpop.permute.xlu0 %1415  ;;  %v1380_v4 = vpop.permute.xlu1 %1379 }
 0xbc1   :  { %v1431_v60 = vsel %vm253_vm1, %v3831_v36, %v1416_v3  ;;  %v1386_v5 = vsel %vm253_vm1, %v1380_v4, %v3845_v48 }
 0xbc2   :  { %2870 = vmatmul.mubr.msk.bf16.vlgmr.msra.gmra.mxu1 %vm416_vm2, %v1441_v58  ;;  %v1437_v10 = vmul.f32 %v1431_v60, %v1386_v5 }
 0xbc3   :  { %2873 = vmatprep.mubr.msk.bf16.mxu1 %vm3158_vm0, %v3157_v1 }
 0xbc4   :  { %v1418_v0 = vpop.permute.xlu1 %1417 }
 0xbc5   :  { %v1432_v9 = vsel %vm253_vm1, %v3837_v40, %v1418_v0 }
 0xbc6   :  { %v1438_v61 = vmul.f32 %v1432_v9, %v1384_v54 }
 0xbc8   :  { %v1442_v6 = vpack.c.bf16 %v1438_v61, %v1437_v10  ;;  %v1420_v12 = vpop.permute.xlu0 %1419 }
 0xbc9   :  { %v1433_v13 = vsel %vm253_vm1, %v3841_v42, %v1420_v12 }
 0xbca   :  { %2874 = vmatmul.mubr.msk.bf16.gmra.mxu1 %vm416_vm2, %v1442_v6  ;;  %v1439_v17 = vmul.f32 %v1433_v13, %v1385_v63 }
 0xbcb   :  { %2877 = vmatprep.mubr.msk.bf16.mxu1 %vm3158_vm0, %v3157_v1 }
 0xbcc   :  { %v1422_v11 = vpop.permute.xlu1 %1421 }
 0xbcd   :  { %v1434_v7 = vsel %vm253_vm1, %v3845_v48, %v1422_v11 }
 0xbce   :  { %v1440_v8 = vmul.f32 %v1434_v7, %v1386_v5 }
 0xbd0   :  { %v1443_v56 = vpack.c.bf16 %v1440_v8, %v1439_v17 }
 0xbd2   :  { %2878 = vmatmul.mubr.msk.bf16.gmra.mxu1 %vm416_vm2, %v1443_v56 }
 0xbd3   :  { %2903 = vmatprep.mubr.msk.bf16.mxu1 %vm3158_vm0, %v3157_v1 }
 0xc82   :  { %v1487_v50 = vpop.f32.mrf.mxu1 }
 0xc83   :  { %v1510_v18 = vmul.f32 0.35355338, %v1487_v50 }
 0xc84   :  { %v2871_v21 = vpop.f32.mrf.mxu1 }
 0xc85   :  { %1522 = vrot.lane.b32.xlu0 %v1510_v18, %s3161_s28 }
 0xc86   :  { %v1490_v22 = vpop.f32.mrf.mxu1 }
 0xc87   :  { %v1511_v59 = vmul.f32 0.35355338, %v1490_v22 }
 0xc88   :  { %v2872_v62 = vpop.f32.mrf.mxu1 }
 0xc89   :  { %1524 = vrot.lane.b32.xlu1 %v1511_v59, %s3161_s28 }
 0xc8a   :  { %v1495_v23 = vpop.f32.mrf.mxu1 }
 0xc8b   :  { %v1512_v15 = vmul.f32 0.35355338, %v1495_v23 }
 0xc8c   :  { %v2875_v24 = vpop.f32.mrf.mxu1 }
 0xc8d   :  { %1526 = vrot.lane.b32.xlu0 %v1512_v15, %s3161_s28 }
 0xc8e   :  { %v1498_v55 = vpop.f32.mrf.mxu1 }
 0xc8f   :  { %v1513_v27 = vmul.f32 0.35355338, %v1498_v55 }
 0xc90   :  { %v2876_v30 = vpop.f32.mrf.mxu1 }
 0xc91   :  { %1528 = vrot.lane.b32.xlu1 %v1513_v27, %s3161_s28 }
 0xc92   :  { %v1503_v31 = vpop.f32.mrf.mxu1 }
 0xc93   :  { %v1514_v32 = vmul.f32 0.35355338, %v1503_v31 }
 0xc94   :  { %v2879_v33 = vpop.f32.mrf.mxu1 }
 0xc95   :  { %1530 = vrot.lane.b32.xlu0 %v1514_v32, %s3161_s28 }
 0xc96   :  { %v1506_v35 = vpop.f32.mrf.mxu1 }
 0xc97   :  { %v1515_v20 = vmul.f32 0.35355338, %v1506_v35 }
 0xc98   :  { %v2880_v39 = vpop.f32.mrf.mxu1 }
 0xc99   :  { %1532 = vrot.lane.b32.xlu1 %v1515_v20, %s3161_s28 }
 0xcf7   :  { %v1523_v41 = vpop.permute.xlu0 %1522 }
 0xcf8   :  { %v1540_v45 = vmax.f32 %v1510_v18, %v1523_v41 }
 0xcfa   :  { %1552 = vrot.lane.b32.xlu0 %v1540_v45, %s3162_s4 }
 0xcfb   :  { %v1525_v28 = vpop.permute.xlu1 %1524 }
 0xcfc   :  { %v1541_v46 = vmax.f32 %v1511_v59, %v1525_v28 }
 0xcfe   :  { %1554 = vrot.lane.b32.xlu1 %v1541_v46, %s3162_s4 }
 0xcff   :  { %v1527_v43 = vpop.permute.xlu0 %1526 }
 0xd00   :  { %v1542_v49 = vmax.f32 %v1512_v15, %v1527_v43 }
 0xd02   :  { %1556 = vrot.lane.b32.xlu0 %v1542_v49, %s3162_s4 }
 0xd03   :  { %v1529_v29 = vpop.permute.xlu1 %1528 }
 0xd04   :  { %v1543_v51 = vmax.f32 %v1513_v27, %v1529_v29 }
 0xd06   :  { %1558 = vrot.lane.b32.xlu1 %v1543_v51, %s3162_s4 }
 0xd07   :  { %v1531_v54 = vpop.permute.xlu0 %1530 }
 0xd08   :  { %v1544_v44 = vmax.f32 %v1514_v32, %v1531_v54  ;;  %v3023_v54 = vld [vmem:[%s4167_s8 + $0x38] sm:$0xff]  }
 0xd09   :  { %2896 = vmatpush3.bf16.msra.mxu1 %v3023_v54 }
 0xd0a   :  { %1560 = vrot.lane.b32.xlu0 %v1544_v44, %s3162_s4  ;;  %2897 = vmatprep.subr.bf16.mxu1 %v3157_v1 }
 0xd0b   :  { %v1533_v57 = vpop.permute.xlu1 %1532 }
 0xd0c   :  { %v1545_v37 = vmax.f32 %v1515_v20, %v1533_v57  ;;  %v3024_v57 = vld [vmem:[%s4167_s8 + $0x30] sm:$0xff]  }
 0xd0d   :  { %2898 = vmatpush3.bf16.msra.mxu1 %v3024_v57 }
 0xd0e   :  { %1562 = vrot.lane.b32.xlu1 %v1545_v37, %s3162_s4  ;;  %2899 = vmatprep.subr.bf16.mxu1 %v3157_v1 }
 0xd6c   :  { %v1553_v52 = vpop.permute.xlu0 %1552 }
 0xd6d   :  { %v1570_v63 = vsel %vm543_vm3, %v1540_v45, %v1553_v52 }
 0xd6e   :  { %v1576_v38 = vsub.f32 %v1510_v18, %v1570_v63 }
 0xd70   :  { %v1582_v2 = vmul.f32 1.442695, %v1576_v38  ;;  %v1555_v58 = vpop.permute.xlu1 %1554 }
 0xd71   :  { %v1571_v3 = vsel %vm543_vm3, %v1541_v46, %v1555_v58 }
 0xd72   :  { %3087 = vpow2.f32 %v1582_v2  ;;  %v1577_v4 = vsub.f32 %v1511_v59, %v1571_v3 }
 0xd74   :  { %v1584_v60 = vmul.f32 1.442695, %v1577_v4  ;;  %v1557_v5 = vpop.permute.xlu0 %1556 }
 0xd75   :  { %v1572_v0 = vsel %vm543_vm3, %v1542_v49, %v1557_v5 }
 0xd76   :  { %3089 = vpow2.f32 %v1584_v60  ;;  %v1578_v9 = vsub.f32 %v1512_v15, %v1572_v0 }
 0xd78   :  { %v1586_v10 = vmul.f32 1.442695, %v1578_v9  ;;  %v1559_v61 = vpop.permute.xlu1 %1558 }
 0xd79   :  { %v1573_v6 = vsel %vm543_vm3, %v1543_v51, %v1559_v61 }
 0xd7a   :  { %3091 = vpow2.f32 %v1586_v10  ;;  %v1579_v12 = vsub.f32 %v1513_v27, %v1573_v6 }
 0xd7c   :  { %v1588_v13 = vmul.f32 1.442695, %v1579_v12  ;;  %v1561_v11 = vpop.permute.xlu0 %1560  ;;  %v3025_v12 = vld [vmem:[%s4167_s8 + $0x28] sm:$0xff]  }
 0xd7d   :  { %v1574_v7 = vsel %vm543_vm3, %v1544_v44, %v1561_v11  ;;  %2900 = vmatpush3.bf16.msra.mxu1 %v3025_v12 }
 0xd7e   :  { %3093 = vpow2.f32 %v1588_v13  ;;  %v1580_v17 = vsub.f32 %v1514_v32, %v1574_v7  ;;  %2901 = vmatprep.subr.bf16.mxu1 %v3157_v1  ;;  %v3026_v13 = vld [vmem:[%s4167_s8 + $0x20] sm:$0xff]  }
 0xd7f   :  { %v3893_v8 = vpop.eup %3087 }
 0xd80   :  { %v1590_v56 = vmul.f32 1.442695, %v1580_v17  ;;  %1600 = vrot.lane.b32.xlu0 %v3893_v8, %s3161_s28  ;;  %v1563_v50 = vpop.permute.xlu1 %1562 }
 0xd81   :  { %v1575_v18 = vsel %vm543_vm3, %v1545_v37, %v1563_v50  ;;  %2902 = vmatpush3.bf16.msra.mxu1 %v3026_v13 }
 0xd82   :  { %3095 = vpow2.f32 %v1590_v56  ;;  %v1581_v21 = vsub.f32 %v1515_v20, %v1575_v18  ;;  %2931 = vmatprep.subr.bf16.mxu1 %v3157_v1 }
 0xd83   :  { %v3090_v22 = vpop.eup %3089 }
 0xd84   :  { %v1592_v59 = vmul.f32 1.442695, %v1581_v21  ;;  %1602 = vrot.lane.b32.xlu1 %v3090_v22, %s3161_s28 }
 0xd86   :  { %3097 = vpow2.f32 %v1592_v59 }
 0xd87   :  { %v3899_v62 = vpop.eup %3091 }
 0xd88   :  { %1604 = vrot.lane.b32.xlu0 %v3899_v62, %s3161_s28 }
 0xd8b   :  { %v3094_v23 = vpop.eup %3093 }
 0xd8c   :  { %1606 = vrot.lane.b32.xlu1 %v3094_v23, %s3161_s28 }
 0xd8f   :  { %v3904_v15 = vpop.eup %3095 }
 0xd90   :  { %1608 = vrot.lane.b32.xlu0 %v3904_v15, %s3161_s28 }
 0xd93   :  { %v3908_v24 = vpop.eup %3097 }
 0xd94   :  { %1610 = vrot.lane.b32.xlu1 %v3908_v24, %s3161_s28  ;;  %s3164_s28 = smov [#allocation2]  }
 0xd95   :  { %s2458_s29 = sshll.u32 %s3164_s28, 4  ;;  %s2459_s29 = int_to_ptr.vmem [resolvable:$true] %s2458_s29 }
 0xd96   :  { %p3140_p1 = scmp.lt.s32.totalorder %s2459_s29, %s2459_s29 }
 0xdf2   :  { %v1601_v55 = vpop.permute.xlu0 %1600 }
 0xdf3   :  { %v1618_v27 = vadd.f32 %v3893_v8, %v1601_v55 }
 0xdf5   :  { %3099 = vrcp.f32 %v1618_v27 }
 0xdf6   :  { %v1603_v30 = vpop.permute.xlu1 %1602 }
 0xdf7   :  { %v1619_v31 = vadd.f32 %v3090_v22, %v1603_v30 }
 0xdf9   :  { %3101 = vrcp.f32 %v1619_v31 }
 0xdfa   :  { %v1605_v32 = vpop.permute.xlu0 %1604 }
 0xdfb   :  { %v1620_v33 = vadd.f32 %v3899_v62, %v1605_v32 }
 0xdfd   :  { %3103 = vrcp.f32 %v1620_v33 }
 0xdfe   :  { %v1607_v35 = vpop.permute.xlu1 %1606 }
 0xdff   :  { %v1621_v20 = vadd.f32 %v3094_v23, %v1607_v35 }
 0xe01   :  { %3105 = vrcp.f32 %v1621_v20 }
 0xe02   :  { %v3100_v39 = vpop.eup %3099  ;;  %v1609_v41 = vpop.permute.xlu0 %1608 }
 0xe03   :  { %v1622_v45 = vadd.f32 %v3904_v15, %v1609_v41  ;;  %1636 = vrot.lane.b32.xlu0 %v3100_v39, %s3162_s4 }
 0xe05   :  { %3107 = vrcp.f32 %v1622_v45 }
 0xe06   :  { %v3102_v28 = vpop.eup %3101  ;;  %v1611_v46 = vpop.permute.xlu1 %1610 }
 0xe07   :  { %v1623_v43 = vadd.f32 %v3908_v24, %v1611_v46  ;;  %1638 = vrot.lane.b32.xlu1 %v3102_v28, %s3162_s4 }
 0xe09   :  { %3109 = vrcp.f32 %v1623_v43 }
 0xe0a   :  { %v3104_v49 = vpop.eup %3103 }
 0xe0b   :  { %1640 = vrot.lane.b32.xlu0 %v3104_v49, %s3162_s4 }
 0xe0e   :  { %v3106_v29 = vpop.eup %3105 }
 0xe0f   :  { %1642 = vrot.lane.b32.xlu1 %v3106_v29, %s3162_s4 }
 0xe12   :  { %v3108_v51 = vpop.eup %3107 }
 0xe13   :  { %1644 = vrot.lane.b32.xlu0 %v3108_v51, %s3162_s4 }
 0xe16   :  { %v3110_v44 = vpop.eup %3109 }
 0xe17   :  { %1387 = vrot.lane.b32.xlu0 %v3819_v19, %s3163_s22  ;;  %1646 = vrot.lane.b32.xlu1 %v3110_v44, %s3162_s4 }
 0xe1b   :  { %1399 = vrot.lane.b32.xlu0 %v3837_v40, %s3160_s27  ;;  %1389 = vrot.lane.b32.xlu1 %v3825_v34, %s3163_s22 }
 0xe1f   :  { %1391 = vrot.lane.b32.xlu0 %v3831_v36, %s3163_s22  ;;  %1401 = vrot.lane.b32.xlu1 %v3841_v42, %s3160_s27 }
 0xe23   :  { %1403 = vrot.lane.b32.xlu1 %v3845_v48, %s3160_s27 }
 0xe75   :  { %v1637_v19 = vpop.permute.xlu0 %1636 }
 0xe76   :  { %v1654_v37 = vsel %vm543_vm3, %v3100_v39, %v1637_v19 }
 0xe77   :  { %v1660_v34 = vmul.f32 %v3893_v8, %v1654_v37 }
 0xe79   :  { %v1639_v52 = vpop.permute.xlu1 %1638 }
 0xe7a   :  { %v1655_v40 = vsel %vm543_vm3, %v3102_v28, %v1639_v52 }
 0xe7b   :  { %v1661_v63 = vmul.f32 %v3090_v22, %v1655_v40 }
 0xe7d   :  { %v1666_v38 = vpack.c.bf16 %v1661_v63, %v1660_v34  ;;  %v1641_v2 = vpop.permute.xlu0 %1640 }
 0xe7e   :  { %v1656_v36 = vsel %vm543_vm3, %v3104_v49, %v1641_v2 }
 0xe7f   :  { %2884 = vmatmul.mubr.msk.bf16.vlgmr.msra.gmra.mxu0 %vm643_vm5, %v1666_v38  ;;  %v1662_v58 = vmul.f32 %v3899_v62, %v1656_v36 }
 0xe80   :  { %2887 = vmatprep.mubr.msk.bf16.mxu0 %vm3158_vm0, %v3157_v1 }
 0xe81   :  { %v1643_v42 = vpop.permute.xlu1 %1642 }
 0xe82   :  { %v1657_v48 = vsel %vm543_vm3, %v3106_v29, %v1643_v42 }
 0xe83   :  { %v1663_v3 = vmul.f32 %v3094_v23, %v1657_v48 }
 0xe85   :  { %v1667_v4 = vpack.c.bf16 %v1663_v3, %v1662_v58  ;;  %v1645_v60 = vpop.permute.xlu0 %1644 }
 0xe86   :  { %v1658_v5 = vsel %vm543_vm3, %v3108_v51, %v1645_v60  ;;  %v2546_v51 = vld [vmem:[%s4168_s9 + $0x1] ss:$0 sm:$0xff] }
 0xe87   :  { %2888 = vmatmul.mubr.msk.bf16.gmra.mxu0 %vm643_vm5, %v1667_v4  ;;  %v1664_v10 = vmul.f32 %v3904_v15, %v1658_v5 }
 0xe88   :  { %2891 = vmatprep.mubr.msk.bf16.mxu0 %vm3158_vm0, %v3157_v1 }
 0xe89   :  { %v1647_v0 = vpop.permute.xlu1 %1646  ;;  %v1388_v11 = vpop.permute.xlu0 %1387 }
 0xe8a   :  { %v1659_v9 = vsel %vm543_vm3, %v3110_v44, %v1647_v0 }
 0xe8b   :  { %v1665_v61 = vmul.f32 %v3908_v24, %v1659_v9 }
 0xe8d   :  { %v1668_v6 = vpack.c.bf16 %v1665_v61, %v1664_v10  ;;  %v1390_v7 = vpop.permute.xlu1 %1389  ;;  %v1400_v8 = vpop.permute.xlu0 %1399 }
 0xe8e   :  { %v1408_v18 = vsel %vm253_vm1, %v1388_v11, %v1400_v8 }
 0xe8f   :  { %2892 = vmatmul.mubr.msk.bf16.gmra.mxu0 %vm643_vm5, %v1668_v6 }
 0xe90   :  { %2919 = vmatprep.mubr.msk.bf16.mxu0 %vm3158_vm0, %v3157_v1 }
 0xe91   :  { %v1402_v56 = vpop.permute.xlu1 %1401  ;;  %v1392_v30 = vpop.permute.xlu0 %1391 }
 0xe92   :  { %v1409_v21 = vsel %vm253_vm1, %v1390_v7, %v1402_v56 }
 0xe95   :  { %v1404_v55 = vpop.permute.xlu1 %1403 }
 0xe96   :  { %v1410_v31 = vsel %vm253_vm1, %v1392_v30, %v1404_v55 }
 0xf3f   :  { %v1712_v17 = vpop.f32.mrf.mxu0 }
 0xf40   :  { %v1735_v59 = vmul.f32 %v1712_v17, %v1408_v18 }
 0xf41   :  { %v2885_v50 = vpop.f32.mrf.mxu0 }
 0xf43   :  { %v1715_v22 = vpop.f32.mrf.mxu0 }
 0xf44   :  { %v1736_v62 = vmul.f32 %v1715_v22, %v1409_v21 }
 0xf45   :  { %v2886_v23 = vpop.f32.mrf.mxu0 }
 0xf46   :  { %v1752_v15 = vpack.c.bf16 %v1736_v62, %v1735_v59 }
 0xf47   :  { %v1720_v24 = vpop.f32.mrf.mxu0 }
 0xf48   :  { %2904 = vmatmul.mubr.msk.bf16.vlgmr.msra.gmra.mxu1 %vm416_vm2, %v1752_v15  ;;  %v1737_v33 = vmul.f32 %v1720_v24, %v1410_v31 }
 0xf49   :  { %v2889_v27 = vpop.f32.mrf.mxu0  ;;  %2907 = vmatprep.mubr.msk.bf16.mxu1 %vm3158_vm0, %v3157_v1 }
 0xf4b   :  { %v1723_v32 = vpop.f32.mrf.mxu0 }
 0xf4c   :  { %v1738_v35 = vmul.f32 %v1723_v32, %v1408_v18 }
 0xf4d   :  { %v2890_v20 = vpop.f32.mrf.mxu0 }
 0xf4e   :  { %v1753_v39 = vpack.c.bf16 %v1738_v35, %v1737_v33 }
 0xf4f   :  { %v1728_v41 = vpop.f32.mrf.mxu0 }
 0xf50   :  { %2908 = vmatmul.mubr.msk.bf16.gmra.mxu1 %vm416_vm2, %v1753_v39  ;;  %v1739_v46 = vmul.f32 %v1728_v41, %v1409_v21 }
 0xf51   :  { %v2893_v45 = vpop.f32.mrf.mxu0  ;;  %2911 = vmatprep.mubr.msk.bf16.mxu1 %vm3158_vm0, %v3157_v1 }
 0xf53   :  { %v1731_v28 = vpop.f32.mrf.mxu0 }
 0xf54   :  { %v1740_v43 = vmul.f32 %v1731_v28, %v1410_v31 }
 0xf55   :  { %v2894_v49 = vpop.f32.mrf.mxu0 }
 0xf56   :  { %v1754_v29 = vpack.c.bf16 %v1740_v43, %v1739_v46  ;;  %v3027_v49 = vld [vmem:[%s4169_s10 + $0x18] sm:$0xff]  }
 0xf57   :  { %2916 = vmatpush3.bf16.msra.mxu0 %v3027_v49 }
 0xf58   :  { %2912 = vmatmul.mubr.msk.bf16.gmra.mxu1 %vm416_vm2, %v1754_v29  ;;  %2917 = vmatprep.subr.bf16.mxu0 %v3157_v1  ;;  %v3028_v29 = vld [vmem:[%s4169_s10 + $0x10] sm:$0xff]  }
 0xf59   :  { %2947 = vmatprep.mubr.msk.bf16.mxu1 %vm3158_vm0, %v3157_v1 }
 0xf5b   :  { %2918 = vmatpush3.bf16.msra.mxu0 %v3028_v29 }
 0xf5c   :  { %2959 = vmatprep.subr.mxu0 %v3157_v1 }
0x1008   :  { %v1828_v54 = vpop.f32.mrf.mxu1 }
0x1009   :  { %v1829_v44 = vadd.f32 %v2546_v51, %v1828_v54  ;;  %v3030_v54 = vld [vmem:[%s4171_s12 + $0x70] sm:$0xff]  }
0x100a   :  { %v2905_v57 = vpop.f32.mrf.mxu1 }
0x100b   :  { %v1851_v19 = vadd.f32 %v1829_v44, %v3783_v47  ;;  %v3031_v44 = vld [vmem:[%s4171_s12 + $0x68] sm:$0xff]   ;;  %v3032_v57 = vld [vmem:[%s4171_s12 + $0x60] sm:$0xff]  }
0x100c   :  { %v1831_v37 = vpop.f32.mrf.mxu1 }
0x100d   :  { %v1832_v52 = vadd.f32 %v2546_v51, %v1831_v37  ;;  %v1861_v40 = vsel %vm253_vm1, %v1851_v19, 0.0 }
0x100e   :  { %1862 = vadd.xlane.f32.xlu0 %v1861_v40  ;;  %v2906_v34 = vpop.f32.mrf.mxu1 }
0x100f   :  { %v1852_v63 = vadd.f32 %v1832_v52, %v3785_v16 }
0x1010   :  { %v1836_v38 = vpop.f32.mrf.mxu1 }
0x1011   :  { %v1837_v2 = vadd.f32 %v2546_v51, %v1836_v38  ;;  %v1864_v36 = vsel %vm253_vm1, %v1852_v63, 0.0 }
0x1012   :  { %1865 = vadd.xlane.f32.xlu1 %v1864_v36  ;;  %v2909_v42 = vpop.f32.mrf.mxu1 }
0x1013   :  { %v1853_v48 = vadd.f32 %v1837_v2, %v3796_v53 }
0x1014   :  { %v1839_v58 = vpop.f32.mrf.mxu1 }
0x1015   :  { %v1840_v3 = vadd.f32 %v2546_v51, %v1839_v58  ;;  %v1867_v47 = vsel %vm253_vm1, %v1853_v48, 0.0 }
0x1016   :  { %1868 = vadd.xlane.f32.xlu0 %v1867_v47  ;;  %v2910_v4 = vpop.f32.mrf.mxu1 }
0x1017   :  { %v1854_v60 = vadd.f32 %v1840_v3, %v3798_v14 }
0x1018   :  { %v1844_v5 = vpop.f32.mrf.mxu1 }
0x1019   :  { %v1845_v0 = vadd.f32 %v2546_v51, %v1844_v5  ;;  %v1870_v16 = vsel %vm253_vm1, %v1854_v60, 0.0 }
0x101a   :  { %1871 = vadd.xlane.f32.xlu0 %v1870_v16  ;;  %v2913_v9 = vpop.f32.mrf.mxu1  ;;  %v2556_v16 = vld [vmem:[%s4173_s14 + $0x1] ss:$0 sm:$0xff] }
0x101b   :  { %v1855_v10 = vadd.f32 %v1845_v0, %v3807_v25 }
0x101c   :  { %v1847_v61 = vpop.f32.mrf.mxu1 }
0x101d   :  { %v1848_v6 = vadd.f32 %v2546_v51, %v1847_v61  ;;  %v1873_v53 = vsel %vm253_vm1, %v1855_v10, 0.0  ;;  %v3029_v51 = vld [vmem:[%s4171_s12 + $0x78] sm:$0xff]  }
0x101e   :  { %1874 = vadd.xlane.f32.xlu1 %v1873_v53  ;;  %v2914_v12 = vpop.f32.mrf.mxu1  ;;  %2932 = vmatpush3.bf16.msra.mxu1 %v3029_v51 }
0x101f   :  { %v1856_v13 = vadd.f32 %v1848_v6, %v3809_v26  ;;  %2933 = vmatprep.subr.bf16.mxu1 %v3157_v1 }
0x1021   :  { %v1876_v11 = vsel %vm253_vm1, %v1856_v13, 0.0 }
0x1022   :  { %1877 = vadd.xlane.f32.xlu0 %v1876_v11  ;;  %2934 = vmatpush3.bf16.msra.mxu1 %v3030_v54 }
0x1023   :  { %2935 = vmatprep.subr.bf16.mxu1 %v3157_v1 }
0x1026   :  { %2936 = vmatpush3.bf16.msra.mxu1 %v3031_v44 }
0x1027   :  { %2937 = vmatprep.subr.bf16.mxu1 %v3157_v1 }
0x102a   :  { %2938 = vmatpush3.bf16.msra.mxu1 %v3032_v57 }
0x102b   :  { %2939 = vmatprep.subr.bf16.mxu1 %v3157_v1 }
0x1097   :  { %v1863_v14 = vpop.xlane.xlu0 %1862 }
0x1098   :  { %v1879_v7 = vmul.f32 0.03125, %v1863_v14 }
0x109a   :  { %v3996_v17 = vsub.f32 %v1851_v19, %v1879_v7  ;;  %v3033_v19 = vld [vmem:[%s4171_s12 + $0x58] sm:$0xff]  }
0x109b   :  { %v1866_v8 = vpop.xlane.xlu1 %1865  ;;  %2940 = vmatpush3.bf16.msra.mxu1 %v3033_v19 }
0x109c   :  { %v1880_v56 = vmul.f32 0.03125, %v1866_v8  ;;  %v1891_v25 = vmul.f32 %v3996_v17, %v3996_v17  ;;  %2941 = vmatprep.subr.bf16.mxu1 %v3157_v1 }
0x109e   :  { %v4000_v50 = vsub.f32 %v1852_v63, %v1880_v56  ;;  %v1897_v18 = vsel %vm253_vm1, %v1891_v25, 0.0 }
0x109f   :  { %v1869_v21 = vpop.xlane.xlu0 %1868  ;;  %1898 = vadd.xlane.f32.xlu1 %v1897_v18 }
0x10a0   :  { %v1881_v22 = vmul.f32 0.03125, %v1869_v21  ;;  %v1892_v26 = vmul.f32 %v4000_v50, %v4000_v50 }
0x10a2   :  { %v4005_v59 = vsub.f32 %v1853_v48, %v1881_v22  ;;  %v1900_v62 = vsel %vm253_vm1, %v1892_v26, 0.0 }
0x10a3   :  { %v1872_v23 = vpop.xlane.xlu0 %1871  ;;  %1901 = vadd.xlane.f32.xlu0 %v1900_v62 }
0x10a4   :  { %v1882_v15 = vmul.f32 0.03125, %v1872_v23  ;;  %v1893_v24 = vmul.f32 %v4005_v59, %v4005_v59 }
0x10a6   :  { %v4010_v55 = vsub.f32 %v1854_v60, %v1882_v15  ;;  %v1903_v27 = vsel %vm253_vm1, %v1893_v24, 0.0 }
0x10a7   :  { %1904 = vadd.xlane.f32.xlu1 %v1903_v27  ;;  %v1875_v30 = vpop.xlane.xlu1 %1874 }
0x10a8   :  { %v1883_v31 = vmul.f32 0.03125, %v1875_v30  ;;  %v1894_v32 = vmul.f32 %v4010_v55, %v4010_v55 }
0x10aa   :  { %v4015_v33 = vsub.f32 %v1855_v10, %v1883_v31  ;;  %v1906_v35 = vsel %vm253_vm1, %v1894_v32, 0.0 }
0x10ab   :  { %1907 = vadd.xlane.f32.xlu0 %v1906_v35  ;;  %v1878_v20 = vpop.xlane.xlu0 %1877  ;;  %v3035_v35 = vld [vmem:[%s4171_s12 + $0x48] sm:$0xff]  }
0x10ac   :  { %v1884_v39 = vmul.f32 0.03125, %v1878_v20  ;;  %v1895_v41 = vmul.f32 %v4015_v33, %v4015_v33  ;;  %v3036_v20 = vld [vmem:[%s4171_s12 + $0x40] sm:$0xff]  }
0x10ae   :  { %v4020_v45 = vsub.f32 %v1856_v13, %v1884_v39  ;;  %v1909_v28 = vsel %vm253_vm1, %v1895_v41, 0.0  ;;  %v2557_v13 = vld [vmem:[%s4174_s15 + $0x1] ss:$0 sm:$0xff] }
0x10af   :  { %1910 = vadd.xlane.f32.xlu1 %v1909_v28  ;;  %v2563_v39 = vld [vmem:[%s4170_s11 + $0x1] ss:$0 sm:$0xff] }
0x10b0   :  { %v1896_v46 = vmul.f32 %v4020_v45, %v4020_v45 }
0x10b2   :  { %v1912_v43 = vsel %vm253_vm1, %v1896_v46, 0.0 }
0x10b3   :  { %1913 = vadd.xlane.f32.xlu0 %v1912_v43 }
0x1128   :  { %v1899_v37 = vpop.xlane.xlu1 %1898 }
0x1129   :  { %v1915_v52 = vmul.f32 0.03125, %v1899_v37 }
0x112b   :  { %v1921_v40 = vadd.f32 1e-05, %v1915_v52 }
0x112c   :  { %v1902_v34 = vpop.xlane.xlu0 %1901 }
0x112d   :  { %3111 = vrsqrt.f32 %v1921_v40  ;;  %v1916_v63 = vmul.f32 0.03125, %v1902_v34 }
0x112f   :  { %v1922_v38 = vadd.f32 1e-05, %v1916_v63 }
0x1130   :  { %v1905_v2 = vpop.xlane.xlu1 %1904 }
0x1131   :  { %3113 = vrsqrt.f32 %v1922_v38  ;;  %v1917_v36 = vmul.f32 0.03125, %v1905_v2 }
0x1133   :  { %v1923_v42 = vadd.f32 1e-05, %v1917_v36 }
0x1134   :  { %v1908_v48 = vpop.xlane.xlu0 %1907 }
0x1135   :  { %3115 = vrsqrt.f32 %v1923_v42  ;;  %v1918_v58 = vmul.f32 0.03125, %v1908_v48 }
0x1137   :  { %v1924_v3 = vadd.f32 1e-05, %v1918_v58 }
0x1138   :  { %v1911_v47 = vpop.xlane.xlu1 %1910 }
0x1139   :  { %3117 = vrsqrt.f32 %v1924_v3  ;;  %v1919_v4 = vmul.f32 0.03125, %v1911_v47 }
0x113a   :  { %v3112_v60 = vpop.eup %3111 }
0x113b   :  { %v1933_v5 = vmul.f32 %v3112_v60, %v3996_v17  ;;  %v1925_v0 = vadd.f32 1e-05, %v1919_v4 }
0x113c   :  { %v1914_v9 = vpop.xlane.xlu0 %1913 }
0x113d   :  { %3119 = vrsqrt.f32 %v1925_v0  ;;  %v1920_v10 = vmul.f32 0.03125, %v1914_v9  ;;  %v1945_v6 = vmul.f32 %v2556_v16, %v1933_v5 }
0x113e   :  { %v3114_v61 = vpop.eup %3113 }
0x113f   :  { %v1934_v53 = vmul.f32 %v3114_v61, %v4000_v50  ;;  %v1926_v12 = vadd.f32 1e-05, %v1920_v10  ;;  %v4062_v7 = vadd.f32 %v2557_v13, %v1945_v6 }
0x1141   :  { %v1946_v11 = vmul.f32 %v2556_v16, %v1934_v53  ;;  %3121 = vrsqrt.f32 %v1926_v12  ;;  %v2586_v12 = vld [vmem:[%s4172_s13 + $0x1] ss:$0 sm:$0xff] }
0x1142   :  { %v3116_v14 = vpop.eup %3115 }
0x1143   :  { %v4064_v17 = vadd.f32 %v2557_v13, %v1946_v11  ;;  %v1935_v8 = vmul.f32 %v3116_v14, %v4005_v59 }
0x1145   :  { %v1970_v56 = vpack.c.bf16 %v4064_v17, %v4062_v7  ;;  %v1947_v18 = vmul.f32 %v2556_v16, %v1935_v8 }
0x1146   :  { %v3118_v25 = vpop.eup %3117 }
0x1147   :  { %2920 = vmatmul.mubr.msk.bf16.vlgmr.msra.gmra.mxu0 %vm253_vm1, %v1970_v56  ;;  %v1936_v50 = vmul.f32 %v3118_v25, %v4010_v55  ;;  %v4073_v26 = vadd.f32 %v2557_v13, %v1947_v18 }
0x1148   :  { %2923 = vmatprep.mubr.msk.bf16.mxu0 %vm3158_vm0, %v3157_v1 }
0x1149   :  { %v1948_v21 = vmul.f32 %v2556_v16, %v1936_v50 }
0x114a   :  { %v3120_v22 = vpop.eup %3119 }
0x114b   :  { %v4075_v62 = vadd.f32 %v2557_v13, %v1948_v21  ;;  %v1937_v59 = vmul.f32 %v3120_v22, %v4015_v33  ;;  %v3034_v33 = vld [vmem:[%s4171_s12 + $0x50] sm:$0xff]  }
0x114c   :  { %2942 = vmatpush3.bf16.msra.mxu1 %v3034_v33 }
0x114d   :  { %v1971_v23 = vpack.c.bf16 %v4075_v62, %v4073_v26  ;;  %v1949_v55 = vmul.f32 %v2556_v16, %v1937_v59  ;;  %2943 = vmatprep.subr.bf16.mxu1 %v3157_v1 }
0x114e   :  { %v3122_v15 = vpop.eup %3121 }
0x114f   :  { %2924 = vmatmul.mubr.msk.bf16.gmra.mxu0 %vm253_vm1, %v1971_v23  ;;  %v1938_v24 = vmul.f32 %v3122_v15, %v4020_v45  ;;  %v1961_v30 = vadd.f32 %v2557_v13, %v1949_v55 }
0x1150   :  { %2927 = vmatprep.mubr.msk.bf16.mxu0 %vm3158_vm0, %v3157_v1  ;;  %2944 = vmatpush3.bf16.msra.mxu1 %v3035_v35 }
0x1151   :  { %v1950_v27 = vmul.f32 %v2556_v16, %v1938_v24  ;;  %2945 = vmatprep.subr.bf16.mxu1 %v3157_v1 }
0x1153   :  { %v4084_v31 = vadd.f32 %v2557_v13, %v1950_v27 }
0x1154   :  { %2946 = vmatpush3.bf16.msra.mxu1 %v3036_v20 }
0x1155   :  { %v1972_v32 = vpack.c.bf16 %v4084_v31, %v1961_v30 }
0x1157   :  { %2928 = vmatmul.mubr.msk.bf16.gmra.mxu0 %vm253_vm1, %v1972_v32 }
0x1158   :  { %2971 = vmatprep.mubr.msk.f32.mxu0 %vm3158_vm0, %v3157_v1 }
0x1207   :  { %v2034_v41 = vpop.f32.mrf.mxu0 }
0x1208   :  { %v2035_v28 = vadd.f32 %v2563_v39, %v2034_v41 }
0x1209   :  { %v2921_v45 = vpop.f32.mrf.mxu0 }
0x120a   :  { %v2057_v29 = vmax.f32 %v2035_v28, 0.0 }
0x120b   :  { %v2037_v46 = vpop.f32.mrf.mxu0 }
0x120c   :  { %v2038_v43 = vadd.f32 %v2563_v39, %v2037_v46 }
0x120d   :  { %v2922_v49 = vpop.f32.mrf.mxu0 }
0x120e   :  { %v2058_v51 = vmax.f32 %v2038_v43, 0.0 }
0x120f   :  { %v2042_v54 = vpop.f32.mrf.mxu0 }
0x1210   :  { %v2082_v44 = vpack.c.bf16 %v2058_v51, %v2057_v29  ;;  %v2043_v19 = vadd.f32 %v2563_v39, %v2042_v54 }
0x1211   :  { %v2925_v57 = vpop.f32.mrf.mxu0 }
0x1212   :  { %2948 = vmatmul.mubr.bf16.vlgmr.msra.gmra.mxu1 %v2082_v44  ;;  %v2059_v34 = vmax.f32 %v2043_v19, 0.0 }
0x1213   :  { %v2045_v37 = vpop.f32.mrf.mxu0  ;;  %2951 = vmatprep.mubr.msk.bf16.mxu1 %vm3158_vm0, %v3157_v1 }
0x1214   :  { %v2046_v52 = vadd.f32 %v2563_v39, %v2045_v37 }
0x1215   :  { %v2926_v40 = vpop.f32.mrf.mxu0 }
0x1216   :  { %v2060_v63 = vmax.f32 %v2046_v52, 0.0 }
0x1217   :  { %v2050_v38 = vpop.f32.mrf.mxu0 }
0x1218   :  { %v2083_v2 = vpack.c.bf16 %v2060_v63, %v2059_v34  ;;  %v2051_v42 = vadd.f32 %v2563_v39, %v2050_v38 }
0x1219   :  { %v2929_v36 = vpop.f32.mrf.mxu0 }
0x121a   :  { %2952 = vmatmul.mubr.bf16.gmra.mxu1 %v2083_v2  ;;  %v2061_v47 = vmax.f32 %v2051_v42, 0.0 }
0x121b   :  { %v2053_v48 = vpop.f32.mrf.mxu0  ;;  %2955 = vmatprep.mubr.msk.bf16.mxu1 %vm3158_vm0, %v3157_v1 }
0x121c   :  { %v2054_v58 = vadd.f32 %v2563_v39, %v2053_v48 }
0x121d   :  { %v2930_v3 = vpop.f32.mrf.mxu0 }
0x121e   :  { %v2062_v4 = vmax.f32 %v2054_v58, 0.0 }
0x1220   :  { %v2084_v60 = vpack.c.bf16 %v2062_v4, %v2061_v47 }
0x1222   :  { %2956 = vmatmul.mubr.bf16.gmra.mxu1 %v2084_v60 }
0x12d2   :  { %v2173_v5 = vpop.f32.mrf.mxu1 }
0x12d3   :  { %v2174_v25 = vadd.f32 %v2586_v12, %v2173_v5 }
0x12d4   :  { %v2949_v0 = vpop.f32.mrf.mxu1 }
0x12d5   :  { %v2196_v24 = vadd.f32 %v2174_v25, %v4062_v7 }
0x12d6   :  { %v2176_v16 = vpop.f32.mrf.mxu1 }
0x12d7   :  { %v2177_v55 = vadd.f32 %v2586_v12, %v2176_v16  ;;  %v2206_v33 = vsel %vm253_vm1, %v2196_v24, 0.0 }
0x12d8   :  { %v2950_v9 = vpop.f32.mrf.mxu1 }
0x12da   :  { %v2181_v10 = vpop.f32.mrf.mxu1 }
0x12db   :  { %v2182_v11 = vadd.f32 %v2586_v12, %v2181_v10 }
0x12dc   :  { %v2953_v61 = vpop.f32.mrf.mxu1 }
0x12dd   :  { %v2198_v18 = vadd.f32 %v2182_v11, %v4073_v26  ;;  %v2197_v26 = vadd.f32 %v2177_v55, %v4064_v17 }
0x12de   :  { %v2184_v6 = vpop.f32.mrf.mxu1 }
0x12df   :  { %v2185_v21 = vadd.f32 %v2586_v12, %v2184_v6  ;;  %v2212_v32 = vsel %vm253_vm1, %v2198_v18, 0.0 }
0x12e0   :  { %v2954_v53 = vpop.f32.mrf.mxu1 }
0x12e1   :  { %v2199_v27 = vadd.f32 %v2185_v21, %v4075_v62 }
0x12e2   :  { %v2189_v13 = vpop.f32.mrf.mxu1 }
0x12e3   :  { %v2190_v14 = vadd.f32 %v2586_v12, %v2189_v13  ;;  %v2215_v35 = vsel %vm253_vm1, %v2199_v27, 0.0 }
0x12e4   :  { %v2957_v8 = vpop.f32.mrf.mxu1 }
0x12e5   :  { %v2200_v56 = vadd.f32 %v2190_v14, %v1961_v30 }
0x12e6   :  { %v2192_v50 = vpop.f32.mrf.mxu1 }
0x12e7   :  { %v2193_v22 = vadd.f32 %v2586_v12, %v2192_v50  ;;  %v2218_v59 = vsel %vm253_vm1, %v2200_v56, 0.0 }
0x12e8   :  { %2219 = vadd.xlane.f32.xlu0 %v2218_v59  ;;  %v2958_v23 = vpop.f32.mrf.mxu1 }
0x12e9   :  { %v2201_v15 = vadd.f32 %v2193_v22, %v4084_v31  ;;  %v2209_v31 = vsel %vm253_vm1, %v2197_v26, 0.0  ;;  %v2597_v23 = vld [vmem:[%s4175_s16 + $0x1] ss:$0 sm:$0xff] }
0x12eb   :  { %v2221_v30 = vsel %vm253_vm1, %v2201_v15, 0.0 }
0x12ec   :  { %2213 = vadd.xlane.f32.xlu0 %v2212_v32  ;;  %2222 = vadd.xlane.f32.xlu1 %v2221_v30 }
0x12f0   :  { %2207 = vadd.xlane.f32.xlu0 %v2206_v33  ;;  %2216 = vadd.xlane.f32.xlu1 %v2215_v35 }
0x12f4   :  { %2210 = vadd.xlane.f32.xlu1 %v2209_v31 }
0x1371   :  { %v2220_v7 = vpop.xlane.xlu0 %2219 }
0x1372   :  { %v2228_v20 = vmul.f32 0.03125, %v2220_v7 }
0x1374   :  { %v2234_v62 = vsub.f32 %v2200_v56, %v2228_v20 }
0x1375   :  { %v2214_v39 = vpop.xlane.xlu0 %2213  ;;  %v2223_v41 = vpop.xlane.xlu1 %2222 }
0x1376   :  { %v2226_v45 = vmul.f32 0.03125, %v2214_v39  ;;  %v2229_v28 = vmul.f32 0.03125, %v2223_v41  ;;  %v2240_v46 = vmul.f32 %v2234_v62, %v2234_v62 }
0x1378   :  { %v2232_v43 = vsub.f32 %v2198_v18, %v2226_v45  ;;  %v2235_v49 = vsub.f32 %v2201_v15, %v2229_v28  ;;  %v2254_v17 = vsel %vm253_vm1, %v2240_v46, 0.0 }
0x1379   :  { %2255 = vadd.xlane.f32.xlu0 %v2254_v17  ;;  %v2208_v29 = vpop.xlane.xlu0 %2207  ;;  %v2217_v51 = vpop.xlane.xlu1 %2216 }
0x137a   :  { %v2224_v54 = vmul.f32 0.03125, %v2208_v29  ;;  %v2227_v44 = vmul.f32 0.03125, %v2217_v51  ;;  %v2238_v57 = vmul.f32 %v2232_v43, %v2232_v43  ;;  %v2241_v19 = vmul.f32 %v2235_v49, %v2235_v49  ;;  %v2308_v29 = vld [vmem:[%s4164_s5] sm:$0x3]  ;;  %v3037_v51 = vld [vmem:[%s4177_s18 + $0x8] sm:$0xff]  }
0x137c   :  { %v2230_v37 = vsub.f32 %v2196_v24, %v2224_v54  ;;  %v2233_v52 = vsub.f32 %v2199_v27, %v2227_v44  ;;  %v2248_v40 = vsel %vm253_vm1, %v2238_v57, 0.0  ;;  %v2257_v34 = vsel %vm253_vm1, %v2241_v19, 0.0  ;;  %v3038_v54 = vld [vmem:[%s4177_s18] sm:$0xff]   ;;  %s3135_s18 = scalar_lea.vmem %s2459_s29, 32 }
0x137d   :  { %2249 = vadd.xlane.f32.xlu0 %v2248_v40  ;;  %2258 = vadd.xlane.f32.xlu1 %v2257_v34  ;;  %v2211_v63 = vpop.xlane.xlu1 %2210  ;;  %p3136_p0 = scmp.ne.s32.totalorder %s2459_s29, %s3135_s18  ;;  %p3141_p2 = scmp.lt.s32.totalorder %s3135_s18, %s3135_s18 }
0x137e   :  { %v2225_v38 = vmul.f32 0.03125, %v2211_v63  ;;  %v2236_v2 = vmul.f32 %v2230_v37, %v2230_v37  ;;  %v2239_v36 = vmul.f32 %v2233_v52, %v2233_v52 }
0x137f   :  { %p3142_p3 = por %p3141_p2, %p3140_p1 }
0x1380   :  { %v2231_v42 = vsub.f32 %v2197_v26, %v2225_v38  ;;  %v2242_v48 = vsel %vm253_vm1, %v2236_v2, 0.0  ;;  %v2251_v58 = vsel %vm253_vm1, %v2239_v36, 0.0  ;;  %v2598_v26 = vld [vmem:[%s4176_s17 + $0x1] ss:$0 sm:$0xff] }
0x1381   :  { %2243 = vadd.xlane.f32.xlu0 %v2242_v48  ;;  %2252 = vadd.xlane.f32.xlu1 %v2251_v58  ;;  %p3143_p4 = pnand %p3142_p3, %p3136_p0 }
0x1382   :  { %v2237_v3 = vmul.f32 %v2231_v42, %v2231_v42 }
0x1384   :  { %v2245_v47 = vsel %vm253_vm1, %v2237_v3, 0.0 }
0x1385   :  { %2246 = vadd.xlane.f32.xlu1 %v2245_v47 }
0x1402   :  { %v2256_v4 = vpop.xlane.xlu0 %2255 }
0x1403   :  { %v2264_v60 = vmul.f32 0.03125, %v2256_v4 }
0x1405   :  { %v2270_v5 = vadd.f32 1e-05, %v2264_v60 }
0x1406   :  { %v2250_v0 = vpop.xlane.xlu0 %2249  ;;  %v2259_v16 = vpop.xlane.xlu1 %2258 }
0x1407   :  { %v2262_v9 = vmul.f32 0.03125, %v2250_v0  ;;  %v2265_v10 = vmul.f32 0.03125, %v2259_v16  ;;  %3123 = vrsqrt.f32 %v2270_v5 }
0x1409   :  { %v2268_v61 = vadd.f32 1e-05, %v2262_v9  ;;  %v2271_v6 = vadd.f32 1e-05, %v2265_v10 }
0x140a   :  { %v2244_v53 = vpop.xlane.xlu0 %2243  ;;  %v2253_v12 = vpop.xlane.xlu1 %2252 }
0x140b   :  { %3125 = vrsqrt.f32 %v2268_v61  ;;  %v2260_v13 = vmul.f32 0.03125, %v2244_v53  ;;  %v2263_v11 = vmul.f32 0.03125, %v2253_v12 }
0x140c   :  { %3127 = vrsqrt.f32 %v2271_v6 }
0x140d   :  { %v2266_v14 = vadd.f32 1e-05, %v2260_v13  ;;  %v2269_v8 = vadd.f32 1e-05, %v2263_v11 }
0x140e   :  { %v2247_v56 = vpop.xlane.xlu1 %2246 }
0x140f   :  { %3129 = vrsqrt.f32 %v2266_v14  ;;  %v2261_v25 = vmul.f32 0.03125, %v2247_v56 }
0x1410   :  { %3131 = vrsqrt.f32 %v2269_v8 }
0x1411   :  { %v2267_v50 = vadd.f32 1e-05, %v2261_v25 }
0x1413   :  { %3133 = vrsqrt.f32 %v2267_v50 }
0x1414   :  { %v3124_v18 = vpop.eup %3123 }
0x1415   :  { %v2282_v22 = vmul.f32 %v3124_v18, %v2234_v62 }
0x1417   :  { %v2294_v27 = vmul.f32 %v2597_v23, %v2282_v22 }
0x1418   :  { %v3126_v21 = vpop.eup %3125 }
0x1419   :  { %v3128_v59 = vpop.eup %3127  ;;  %v2280_v32 = vmul.f32 %v3126_v21, %v2232_v43  ;;  %v2306_v7 = vadd.f32 %v2598_v26, %v2294_v27 }
0x141a   :  { %v2283_v15 = vmul.f32 %v3128_v59, %v2235_v49 }
0x141b   :  { %v2292_v62 = vmul.f32 %v2597_v23, %v2280_v32 }
0x141c   :  { %v3130_v24 = vpop.eup %3129  ;;  %v2295_v55 = vmul.f32 %v2597_v23, %v2283_v15 }
0x141d   :  { %v3132_v30 = vpop.eup %3131  ;;  %v2278_v39 = vmul.f32 %v3130_v24, %v2230_v37  ;;  %v2304_v46 = vadd.f32 %v2598_v26, %v2292_v62  ;;  %v2600_v37 = vld [vmem:[%s4178_s19] ss:$0 sm:$0xff] }
0x141e   :  { %v2307_v33 = vadd.f32 %v2598_v26, %v2295_v55  ;;  %v2281_v35 = vmul.f32 %v3132_v30, %v2233_v52 }
0x141f   :  { %v2290_v43 = vmul.f32 %v2597_v23, %v2278_v39 }
0x1420   :  { %v3134_v31 = vpop.eup %3133  ;;  %2960 = vmatpush3.msra.mxu0 %v2307_v33  ;;  %v2293_v20 = vmul.f32 %v2597_v23, %v2281_v35 }
0x1421   :  { %2961 = vmatprep.subr.mxu0 %v3157_v1  ;;  %v2279_v41 = vmul.f32 %v3134_v31, %v2231_v42  ;;  %v2302_v17 = vadd.f32 %v2598_v26, %v2290_v43 }
0x1422   :  { %2962 = vmatpush3.msra.mxu0 %v2306_v7  ;;  %v2305_v45 = vadd.f32 %v2598_v26, %v2293_v20 }
0x1423   :  { %2963 = vmatprep.subr.mxu0 %v3157_v1  ;;  %v2291_v28 = vmul.f32 %v2597_v23, %v2279_v41 }
0x1424   :  { %2964 = vmatpush3.msra.mxu0 %v2305_v45 }
0x1425   :  { %2965 = vmatprep.subr.mxu0 %v3157_v1  ;;  %v2303_v49 = vadd.f32 %v2598_v26, %v2291_v28 }
0x1426   :  { %2966 = vmatpush3.msra.mxu0 %v2304_v46 }
0x1427   :  { %2967 = vmatprep.subr.mxu0 %v3157_v1 }
0x1428   :  { %2968 = vmatpush3.msra.mxu0 %v2303_v49 }
0x1429   :  { %2969 = vmatprep.subr.mxu0 %v3157_v1 }
0x142a   :  { %2970 = vmatpush3.msra.mxu0 %v2302_v17 }
0x142b   :  { %2972 = vmatmul.mubr.msk.f32.vlgmr.msra.gmra.mxu0 %vm2309_vm6, %v2308_v29  ;;  %2974 = vmatprep.subr.bf16.mxu0 %v3157_v1 }
0x142c   :  { %2975 = vmatpush3.bf16.msra.mxu0 %v3037_v51  ;;  %2978 = vmatprep.mubr.msk.bf16.mxu0 %vm3158_vm0, %v3157_v1 }
0x142d   :  { %2976 = vmatprep.subr.bf16.mxu0 %v3157_v1 }
0x1430   :  { %2977 = vmatpush3.bf16.msra.mxu0 %v3038_v54 }
0x14eb   :  { %v2379_v44 = vpop.f32.mrf.mxu0 }
0x14ec   :  { %v2388_v57 = vpack.c.bf16 %v2379_v44, %v2379_v44 }
0x14ed   :  { %v2973_v19 = vpop.f32.mrf.mxu0 }
0x14ee   :  { %2979 = vmatmul.mubr.msk.bf16.vlgmr.msra.gmra.mxu0 %vm253_vm1, %v2388_v57 }
0x15ae   :  { %v2444_v52 = vpop.f32.mrf.mxu0 }
0x15af   :  { %v2445_v40 = vadd.f32 %v2600_v37, %v2444_v52 }
0x15b0   :  { %v2980_v1 = vpop.f32.mrf.mxu0 }
0x15b1   :  { %2451 = vst.msk [vmem:[#allocation2] sm:$0x3] %vm2450_vm7, %v2445_v40 }
0x15b2   :  { %v2447_v34 = vpop.f32.mrf.mxu0 }
0x15b3   :  { %3146 = shalt.err (!%p3143_p4)
}
0x15b4   :  { %2461 = dma.vmem_to_hbm [thread:$0]  %s2459_s29, 32, %s4179_s20, [#allocation3]   ;;  %v2981_v63 = vpop.f32.mrf.mxu0 }
0x15b5   :  { %3155 = dma.done.wait [#allocation3], 32  }
0x15b6   :  { %3156 = vsyncadd [#allocation3], 4294967264 }
0x15b7   :  { %2465 = vsyncpa [#allocation3], 1 }

</bundles_post_ra>
